<compile_context>
chip_gen: v7x
topology: tpu7x:2x2x1
jax: 0.10.0
libtpu: 0.0.40
codegen_flags: <defaults>
</compile_context>

<pallas_src>
import functools

import jax
import jax.numpy as jnp
from jax.experimental import pallas as pl
from jax.experimental.pallas import tpu as pltpu


_DOT_PREC = jax.lax.Precision.HIGHEST  # exact f32 MXU passes; the MXU is otherwise idle


# --------------------------------------------------------------------------- helpers


def _group_sums(x2d, s):
    """x2d: (M, N*T), s: (N*T, N) 0/1 summation matrix -> (M, N) per-node time sums."""
    return jnp.dot(x2d, s, preferred_element_type=jnp.float32, precision=_DOT_PREC)


def _expand_over_time(v2d, s):
    """v2d: (M, N) -> (M, N*T) with out[m, n*T + t] = v2d[m, n].

    Uses the same 0/1 matrix (contracted on its node axis), so the broadcast back
    over time is exact (one 1.0 per output element) and stays lane-dense.
    """
    return jax.lax.dot_general(
        v2d, s, (((1,), (1,)), ((), ())),
        preferred_element_type=jnp.float32, precision=_DOT_PREC)


# --------------------------------------------------------------------------- kernels


def _tnorm_train_kernel(x_ref, g_ref, b_ref, s_ref, out_ref, mean_ref, var_ref,
                        *, eps, batch, time_steps):
    """track_running_stats=True, training=True: batch stats over (B, T) per (c, n)."""
    x = x_ref[...].astype(jnp.float32)            # (B, tc, N*T), lane-dense
    s = s_ref[...]                                # (N*T, N)

    # Reduce over batch on the VPU first (cheap, exact), then over time via the MXU.
    xb = jnp.sum(x, axis=0)                       # (tc, N*T)
    xsq = jnp.sum(x * x, axis=0)                  # (tc, N*T)
    sum1 = _group_sums(xb, s)                     # (tc, N)
    sum2 = _group_sums(xsq, s)                    # (tc, N)

    inv_n = 1.0 / (batch * time_steps)
    mean = sum1 * inv_n
    # One-pass biased variance; clamp tiny negatives from f32 cancellation.
    var = jnp.maximum(sum2 * inv_n - mean * mean, 0.0)

    mean_ref[...] = mean                          # lane-dense (tc, N) stat outputs
    var_ref[...] = var

    scale = g_ref[...].astype(jnp.float32) * jax.lax.rsqrt(var + eps)   # (tc, N)
    shift = b_ref[...].astype(jnp.float32) - mean * scale
    scale_f = _expand_over_time(scale, s)         # (tc, N*T)
    shift_f = _expand_over_time(shift, s)
    out_ref[...] = (x * scale_f + shift_f).astype(out_ref.dtype)


def _tnorm_per_sample_kernel(x_ref, g_ref, b_ref, s_ref, out_ref, *, eps, time_steps):
    """track_running_stats=False: per-sample stats over time only, unbiased variance."""
    B, tc, NT = x_ref.shape
    N = s_ref.shape[1]
    x = x_ref[...].astype(jnp.float32)            # (B, tc, N*T)
    s = s_ref[...]

    x2d = x.reshape(B * tc, NT)                   # free: merges major dims only
    sum1 = _group_sums(x2d, s)                    # (B*tc, N)
    sum2 = _group_sums(x2d * x2d, s)

    mean = sum1 * (1.0 / time_steps)
    # Unbiased variance over time. TODO(synk): T == 1 is ill-defined (torch yields NaN);
    # here the ddof factor is zeroed to avoid a trace-time divide-by-zero.
    ddof_inv = 1.0 / (time_steps - 1) if time_steps > 1 else 0.0
    var = jnp.maximum((sum2 - sum1 * mean) * ddof_inv, 0.0)

    g = g_ref[...].astype(jnp.float32)            # (tc, N), broadcasts over batch
    b = b_ref[...].astype(jnp.float32)
    mean3 = mean.reshape(B, tc, N)
    var3 = var.reshape(B, tc, N)
    scale3 = g * jax.lax.rsqrt(var3 + eps)        # (B, tc, N)
    shift3 = b - mean3 * scale3

    scale_f = _expand_over_time(scale3.reshape(B * tc, N), s).reshape(B, tc, NT)
    shift_f = _expand_over_time(shift3.reshape(B * tc, N), s).reshape(B, tc, NT)
    out_ref[...] = (x * scale_f + shift_f).astype(out_ref.dtype)


def _tnorm_eval_kernel(x_ref, scale_ref, shift_ref, out_ref):
    """track_running_stats=True, training=False: pure lane-dense affine."""
    out_ref[...] = (x_ref[...].astype(jnp.float32) * scale_ref[...]
                    + shift_ref[...]).astype(out_ref.dtype)


# --------------------------------------------------------------------------- tiling


def _pick_channel_tile(B, C, N, T, itemsize, budget_bytes=16 << 20):
    """Largest channel tile whose real VMEM footprint fits the budget.

    Footprint per channel: double-buffered in+out pipeline copies (4x block in the
    native dtype) + ~3 live full-block f32 temps + eval broadcast params; plus the
    double-buffered (N*T, N) summation matrix as a fixed cost.  The (8,128) rule is
    respected on the second-minor block dim: tc must be a multiple of 8 or cover C.
    """
    NT = N * T
    per_ch = 4 * B * NT * itemsize + 3 * B * NT * 4 + 4 * NT * 4
    fixed = 2 * NT * N * 4
    valid = [d for d in range(1, C + 1) if C % d == 0 and (d % 8 == 0 or d == C)]
    fitting = [d for d in valid if d * per_ch + fixed <= budget_bytes]
    if not fitting:
        return min(valid)
    tc = max(fitting)
    # Prefer an even number of grid steps (>= 2) so v7x's two TensorCores split the
    # "parallel" channel axis evenly, as long as the block stays >= half the largest
    # fitting block.  On single-TC v5e/v6e this costs at most one extra ~0.35us step.
    even = [d for d in fitting if (C // d) % 2 == 0 and 2 * d >= tc]
    if even:
        tc = max(even)
    return tc


# --------------------------------------------------------------------------- wrapper


def tnorm_forward(x, gamma, beta, running_mean, running_var, *,
                  track_running_stats=True, training=True,
                  momentum=0.1, eps=1e-5):
    """TNorm forward.

    x: (B, C, N, T); gamma/beta/running_mean/running_var: (1, C, N, 1).
    Returns (out (B, C, N, T), new_running_mean, new_running_var).
    """
    B, C, N, T = x.shape
    NT = N * T

    xf = x.reshape(B, C, NT)                      # free reshape: merge minor dims
    tc = _pick_channel_tile(B, C, N, T, x.dtype.itemsize)
    grid = (C // tc,)

    x_spec = pl.BlockSpec((B, tc, NT), lambda c: (0, c, 0))
    cn_spec = pl.BlockSpec((tc, N), lambda c: (c, 0))     # per-(channel, node) params/stats
    cl_spec = pl.BlockSpec((tc, NT), lambda c: (c, 0))    # lane-dense broadcast params
    s_spec = pl.BlockSpec((NT, N), lambda c: (0, 0))      # constant summation matrix

    cparams = pltpu.CompilerParams(
        dimension_semantics=("parallel",),
        vmem_limit_bytes=48 * 1024 * 1024,
    )

    if track_running_stats and not training:
        # Eval: fold running stats + affine into one scale/shift (plain JAX, O(C*N*T)).
        scale = (gamma.astype(jnp.float32)
                 * jax.lax.rsqrt(running_var.astype(jnp.float32) + eps))
        shift = beta.astype(jnp.float32) - running_mean.astype(jnp.float32) * scale
        scale_f = jnp.broadcast_to(scale, (1, C, N, T)).reshape(C, NT)
        shift_f = jnp.broadcast_to(shift, (1, C, N, T)).reshape(C, NT)
        out = pl.pallas_call(
            _tnorm_eval_kernel,
            out_shape=jax.ShapeDtypeStruct((B, C, NT), x.dtype),
            grid_spec=pltpu.PrefetchScalarGridSpec(
                num_scalar_prefetch=0, grid=grid,
                in_specs=[x_spec, cl_spec, cl_spec],
                out_specs=x_spec),
            compiler_params=cparams,
        )(xf, scale_f, shift_f)
        return out.reshape(B, C, N, T), running_mean, running_var

    # Summation matrix S[n*T + t, n] = 1: one matmul does the per-node time reduction
    # (and, with contraction on its node axis, the exact broadcast back over time).
    S = (jnp.arange(NT, dtype=jnp.int32)[:, None] // T
         == jnp.arange(N, dtype=jnp.int32)[None, :]).astype(jnp.float32)

    g2 = gamma.reshape(C, N)                      # free reshapes of the affine params
    b2 = beta.reshape(C, N)

    if track_running_stats:
        # Training: batch stats in-kernel; running stats never enter the kernel.
        out, mean, var = pl.pallas_call(
            functools.partial(_tnorm_train_kernel, eps=eps, batch=B, time_steps=T),
            out_shape=(jax.ShapeDtypeStruct((B, C, NT), x.dtype),
                       jax.ShapeDtypeStruct((C, N), jnp.float32),
                       jax.ShapeDtypeStruct((C, N), jnp.float32)),
            grid_spec=pltpu.PrefetchScalarGridSpec(
                num_scalar_prefetch=0, grid=grid,
                in_specs=[x_spec, cn_spec, cn_spec, s_spec],
                out_specs=(x_spec, cn_spec, cn_spec)),
            compiler_params=cparams,
        )(xf, g2, b2, S)

        mean4 = mean.reshape(1, C, N, 1)
        var4 = var.reshape(1, C, N, 1)
        n = B * T
        new_rm = momentum * mean4 + (1.0 - momentum) * running_mean
        new_rv = momentum * var4 * (n / (n - 1)) + (1.0 - momentum) * running_var
        return (out.reshape(B, C, N, T),
                new_rm.astype(running_mean.dtype),
                new_rv.astype(running_var.dtype))

    # track_running_stats=False: per-sample time-only stats.
    out = pl.pallas_call(
        functools.partial(_tnorm_per_sample_kernel, eps=eps, time_steps=T),
        out_shape=jax.ShapeDtypeStruct((B, C, NT), x.dtype),
        grid_spec=pltpu.PrefetchScalarGridSpec(
            num_scalar_prefetch=0, grid=grid,
            in_specs=[x_spec, cn_spec, cn_spec, s_spec],
            out_specs=x_spec),
        compiler_params=cparams,
    )(xf, g2, b2, S)
    return out.reshape(B, C, N, T), running_mean, running_var


# --------------------------------------------------------------------------- references


def _ref_train(x, gamma, beta, eps=1e-5):
    mean = jnp.mean(x, axis=(0, 3), keepdims=True)
    var = jnp.mean((x - mean) ** 2, axis=(0, 3), keepdims=True)
    out = (x - mean) / jnp.sqrt(var + eps) * gamma + beta
    return out, mean, var


def _ref_eval(x, gamma, beta, rm, rv, eps=1e-5):
    return (x - rm) / jnp.sqrt(rv + eps) * gamma + beta


def _ref_no_track(x, gamma, beta, eps=1e-5):
    mean = jnp.mean(x, axis=3, keepdims=True)
    var = jnp.var(x, axis=3, keepdims=True, ddof=1)
    return (x - mean) / jnp.sqrt(var + eps) * gamma + beta


# --------------------------------------------------------------------------- test


if __name__ == "__main__":
    B, C, N, T = 2, 4, 16, 16
    key = jax.random.PRNGKey(0)
    kx, kg, kb = jax.random.split(key, 3)

    x = jax.random.normal(kx, (B, C, N, T), dtype=jnp.float32)
    gamma = jnp.ones((1, C, N, 1), jnp.float32) + 0.1 * jax.random.normal(kg, (1, C, N, 1))
    beta = 0.1 * jax.random.normal(kb, (1, C, N, 1))
    running_mean = jnp.zeros((1, C, N, 1), jnp.float32)
    running_var = jnp.ones((1, C, N, 1), jnp.float32)

    # --- training, track_running_stats=True ---
    out, new_rm, new_rv = tnorm_forward(
        x, gamma, beta, running_mean, running_var, training=True)
    jax.block_until_ready((out, new_rm, new_rv))

    ref_out, ref_m, ref_v = _ref_train(x, gamma, beta)
    n = B * T
    ref_rm = 0.1 * ref_m + 0.9 * running_mean
    ref_rv = 0.1 * ref_v * n / (n - 1) + 0.9 * running_var
    assert out.shape == (B, C, N, T)
    assert jnp.allclose(out, ref_out, atol=1e-4, rtol=1e-4), "train output mismatch"
    assert jnp.allclose(new_rm, ref_rm, atol=1e-5, rtol=1e-4), "running_mean mismatch"
    assert jnp.allclose(new_rv, ref_rv, atol=1e-5, rtol=1e-4), "running_var mismatch"

    # --- eval, track_running_stats=True (uses updated running stats) ---
    out_e, _, _ = tnorm_forward(
        x, gamma, beta, new_rm, new_rv, training=False)
    jax.block_until_ready(out_e)
    assert jnp.allclose(out_e, _ref_eval(x, gamma, beta, new_rm, new_rv),
                        atol=1e-4, rtol=1e-4), "eval output mismatch"

    # --- track_running_stats=False (per-sample time-only stats, unbiased var) ---
    out_p, _, _ = tnorm_forward(
        x, gamma, beta, running_mean, running_var,
        track_running_stats=False, training=True)
    jax.block_until_ready(out_p)
    assert jnp.allclose(out_p, _ref_no_track(x, gamma, beta),
                        atol=1e-4, rtol=1e-4), "no-track output mismatch"

    print("KERNEL_OK")
</pallas_src>

<mosaic_0001>
module attributes {stable_mosaic.version = 11 : i64} {
  func.func @_tnorm_train_kernel(%arg0: i32, %arg1: memref<2x4x256xf32, #tpu.memory_space<vmem>>, %arg2: memref<4x16xf32, #tpu.memory_space<vmem>>, %arg3: memref<4x16xf32, #tpu.memory_space<vmem>>, %arg4: memref<256x16xf32, #tpu.memory_space<vmem>>, %arg5: memref<2x4x256xf32, #tpu.memory_space<vmem>>, %arg6: memref<4x16xf32, #tpu.memory_space<vmem>>, %arg7: memref<4x16xf32, #tpu.memory_space<vmem>>) attributes {dimension_semantics = [#tpu.dimension_semantics<parallel>], iteration_bounds = array<i64: 1>, scalar_prefetch = 0 : i64, scratch_operands = 0 : i64, tpu.core_type = #tpu.core_type<tc>, window_params = [{transform_indices = @transform_0, window_bounds = array<i64: 2, 4, 256>}, {transform_indices = @transform_1, window_bounds = array<i64: 4, 16>}, {transform_indices = @transform_2, window_bounds = array<i64: 4, 16>}, {pipeline_mode = #tpu.pipeline_mode<synchronous>, transform_indices = @transform_3, window_bounds = array<i64: 256, 16>}, {transform_indices = @transform_4, window_bounds = array<i64: 2, 4, 256>}, {transform_indices = @transform_5, window_bounds = array<i64: 4, 16>}, {transform_indices = @transform_6, window_bounds = array<i64: 4, 16>}]} {
    %c0 = arith.constant 0 : index
    %c0_0 = arith.constant 0 : index
    %c0_1 = arith.constant 0 : index
    %0 = vector.load %arg1[%c0, %c0_0, %c0_1] : memref<2x4x256xf32, #tpu.memory_space<vmem>>, vector<2x4x256xf32>
    %c0_2 = arith.constant 0 : index
    %c0_3 = arith.constant 0 : index
    %1 = vector.load %arg4[%c0_2, %c0_3] : memref<256x16xf32, #tpu.memory_space<vmem>>, vector<256x16xf32>
    %cst = arith.constant dense<0.000000e+00> : vector<4x256xf32>
    %2 = vector.multi_reduction <add>, %0, %cst [0] : vector<2x4x256xf32> to vector<4x256xf32>
    %3 = arith.mulf %0, %0 : vector<2x4x256xf32>
    %cst_4 = arith.constant dense<0.000000e+00> : vector<4x256xf32>
    %4 = vector.multi_reduction <add>, %3, %cst_4 [0] : vector<2x4x256xf32> to vector<4x256xf32>
    %cst_5 = arith.constant dense<0.000000e+00> : vector<4x16xf32>
    %5 = tpu.matmul %2, %1, %cst_5 {dimension_numbers = #tpu.dot_dimension_numbers<[1], [0], [0], [1], [0, 0, 1, 1], [], []>, precision = #tpu.contract_precision<fp32>} : vector<4x256xf32>, vector<256x16xf32>, vector<4x16xf32> -> vector<4x16xf32>
    %cst_6 = arith.constant dense<0.000000e+00> : vector<4x16xf32>
    %6 = tpu.matmul %4, %1, %cst_6 {dimension_numbers = #tpu.dot_dimension_numbers<[1], [0], [0], [1], [0, 0, 1, 1], [], []>, precision = #tpu.contract_precision<fp32>} : vector<4x256xf32>, vector<256x16xf32>, vector<4x16xf32> -> vector<4x16xf32>
    %cst_7 = arith.constant 3.125000e-02 : f32
    %7 = vector.broadcast %cst_7 : f32 to vector<4x16xf32>
    %8 = arith.mulf %5, %7 : vector<4x16xf32>
    %cst_8 = arith.constant 3.125000e-02 : f32
    %9 = vector.broadcast %cst_8 : f32 to vector<4x16xf32>
    %10 = arith.mulf %6, %9 : vector<4x16xf32>
    %11 = arith.mulf %8, %8 : vector<4x16xf32>
    %12 = arith.subf %10, %11 : vector<4x16xf32>
    %cst_9 = arith.constant 0.000000e+00 : f32
    %13 = vector.broadcast %cst_9 : f32 to vector<4x16xf32>
    %14 = arith.maximumf %12, %13 : vector<4x16xf32>
    %c0_10 = arith.constant 0 : index
    %c0_11 = arith.constant 0 : index
    %15 = vector.load %arg6[%c0_10, %c0_11] : memref<4x16xf32, #tpu.memory_space<vmem>>, vector<4x16xf32>
    tpu.vector_store %arg6[%c0_10, %c0_11], %8 {strides = array<i32>} : memref<4x16xf32, #tpu.memory_space<vmem>>, vector<4x16xf32>,
    %c0_12 = arith.constant 0 : index
    %c0_13 = arith.constant 0 : index
    %16 = vector.load %arg7[%c0_12, %c0_13] : memref<4x16xf32, #tpu.memory_space<vmem>>, vector<4x16xf32>
    tpu.vector_store %arg7[%c0_12, %c0_13], %14 {strides = array<i32>} : memref<4x16xf32, #tpu.memory_space<vmem>>, vector<4x16xf32>,
    %c0_14 = arith.constant 0 : index
    %c0_15 = arith.constant 0 : index
    %17 = vector.load %arg2[%c0_14, %c0_15] : memref<4x16xf32, #tpu.memory_space<vmem>>, vector<4x16xf32>
    %cst_16 = arith.constant 9.99999974E-6 : f32
    %18 = vector.broadcast %cst_16 : f32 to vector<4x16xf32>
    %19 = arith.addf %14, %18 : vector<4x16xf32>
    %20 = math.rsqrt %19 : vector<4x16xf32>
    %21 = arith.mulf %17, %20 : vector<4x16xf32>
    %c0_17 = arith.constant 0 : index
    %c0_18 = arith.constant 0 : index
    %22 = vector.load %arg3[%c0_17, %c0_18] : memref<4x16xf32, #tpu.memory_space<vmem>>, vector<4x16xf32>
    %23 = arith.mulf %8, %21 : vector<4x16xf32>
    %24 = arith.subf %22, %23 : vector<4x16xf32>
    %cst_19 = arith.constant dense<0.000000e+00> : vector<4x256xf32>
    %25 = tpu.matmul %21, %1, %cst_19 {dimension_numbers = #tpu.dot_dimension_numbers<[1], [1], [0], [0], [0, 0, 1, 0], [], []>, precision = #tpu.contract_precision<fp32>} : vector<4x16xf32>, vector<256x16xf32>, vector<4x256xf32> -> vector<4x256xf32>
    %cst_20 = arith.constant dense<0.000000e+00> : vector<4x256xf32>
    %26 = tpu.matmul %24, %1, %cst_20 {dimension_numbers = #tpu.dot_dimension_numbers<[1], [1], [0], [0], [0, 0, 1, 0], [], []>, precision = #tpu.contract_precision<fp32>} : vector<4x16xf32>, vector<256x16xf32>, vector<4x256xf32> -> vector<4x256xf32>
    %27 = vector.shape_cast %25 : vector<4x256xf32> to vector<1x4x256xf32>
    %28 = vector.broadcast %27 : vector<1x4x256xf32> to vector<2x4x256xf32>
    %29 = arith.mulf %0, %28 : vector<2x4x256xf32>
    %30 = vector.shape_cast %26 : vector<4x256xf32> to vector<1x4x256xf32>
    %31 = vector.broadcast %30 : vector<1x4x256xf32> to vector<2x4x256xf32>
    %32 = arith.addf %29, %31 : vector<2x4x256xf32>
    %c0_21 = arith.constant 0 : index
    %c0_22 = arith.constant 0 : index
    %c0_23 = arith.constant 0 : index
    %33 = vector.load %arg5[%c0_21, %c0_22, %c0_23] : memref<2x4x256xf32, #tpu.memory_space<vmem>>, vector<2x4x256xf32>
    tpu.vector_store %arg5[%c0_21, %c0_22, %c0_23], %32 {strides = array<i32>} : memref<2x4x256xf32, #tpu.memory_space<vmem>>, vector<2x4x256xf32>,
    return
  }
  func.func @transform_0(%arg0: i32) -> (i32, i32, i32) {
    %c0_i32 = arith.constant 0 : i32
    %c0_i32_0 = arith.constant 0 : i32
    %c0_i32_1 = arith.constant 0 : i32
    return %c0_i32, %arg0, %c0_i32_0 : i32, i32, i32
  }
  func.func @transform_1(%arg0: i32) -> (i32, i32) {
    %c0_i32 = arith.constant 0 : i32
    %c0_i32_0 = arith.constant 0 : i32
    return %arg0, %c0_i32 : i32, i32
  }
  func.func @transform_2(%arg0: i32) -> (i32, i32) {
    %c0_i32 = arith.constant 0 : i32
    %c0_i32_0 = arith.constant 0 : i32
    return %arg0, %c0_i32 : i32, i32
  }
  func.func @transform_3(%arg0: i32) -> (i32, i32) {
    %c0_i32 = arith.constant 0 : i32
    %c0_i32_0 = arith.constant 0 : i32
    %c0_i32_1 = arith.constant 0 : i32
    return %c0_i32, %c0_i32_0 : i32, i32
  }
  func.func @transform_4(%arg0: i32) -> (i32, i32, i32) {
    %c0_i32 = arith.constant 0 : i32
    %c0_i32_0 = arith.constant 0 : i32
    %c0_i32_1 = arith.constant 0 : i32
    return %c0_i32, %arg0, %c0_i32_0 : i32, i32, i32
  }
  func.func @transform_5(%arg0: i32) -> (i32, i32) {
    %c0_i32 = arith.constant 0 : i32
    %c0_i32_0 = arith.constant 0 : i32
    return %arg0, %c0_i32 : i32, i32
  }
  func.func @transform_6(%arg0: i32) -> (i32, i32) {
    %c0_i32 = arith.constant 0 : i32
    %c0_i32_0 = arith.constant 0 : i32
    return %arg0, %c0_i32 : i32, i32
  }
}

</mosaic_0001>

<bundles_post_ra>
// kernel: tpu_custom_call.1
= control target key start
LH: loop header
LB: loop body
LE: loop exit
PB: predicated region body
PF: predicated region fallthrough
CT: control target
= control target key end

     0   :  { %12 = vsyncpa [#allocation3], 0  ;;  %s7303_s0 = inlined_call_operand.vmem [shape: f32[2,4,256], index: 0, kind: input, shape index: {}]   ;;  %s7304_s1 = inlined_call_operand.vmem [shape: f32[4,16], index: 1, kind: input, shape index: {}]   ;;  %s7305_s2 = inlined_call_operand.vmem [shape: f32[4,16], index: 2, kind: input, shape index: {}]   ;;  %s7306_s3 = inlined_call_operand.vmem [shape: f32[256,16], index: 3, kind: input, shape index: {}]   ;;  %s7307_s4 = inlined_call_operand.hbm [shape: f32[2,4,256], index: 4, kind: output, shape index: {0}]   ;;  %s7308_s5 = inlined_call_operand.hbm [shape: f32[4,16], index: 5, kind: output, shape index: {1}]   ;;  %s7309_s6 = inlined_call_operand.hbm [shape: f32[4,16], index: 6, kind: output, shape index: {2}]  }
   0x1   :  { %v40_v0 = vld [vmem:[%s7306_s3 + $0x80] sm:$0xff]  ;;  %v41_v1 = vld [vmem:[%s7306_s3 + $0x88] sm:$0xff]  ;;  %v42_v7 = vld [vmem:[%s7306_s3 + $0x90] sm:$0xff] }
   0x2   :  { %v24_v2 = vld [vmem:[%s7306_s3] sm:$0xff]  ;;  %v132_v3 = vand.u32 4294901760, %v40_v0  ;;  %v135_v4 = vand.u32 4294901760, %v41_v1  ;;  %v25_v5 = vld [vmem:[%s7306_s3 + $0x8] sm:$0xff]  ;;  %v43_v8 = vld [vmem:[%s7306_s3 + $0x98] sm:$0xff]  ;;  %v138_v10 = vand.u32 4294901760, %v42_v7 }
   0x3   :  { %v84_v6 = vand.u32 4294901760, %v24_v2  ;;  %v87_v9 = vand.u32 4294901760, %v25_v5  ;;  %v141_v11 = vand.u32 4294901760, %v43_v8  ;;  %v26_v12 = vld [vmem:[%s7306_s3 + $0x10] sm:$0xff]  ;;  %v27_v13 = vld [vmem:[%s7306_s3 + $0x18] sm:$0xff]  ;;  %v5476_v14 = vld [vmem:[%s7306_s3 + $0xa0] sm:$0xff] }
   0x4   :  { %v5478_v15 = vpack.c.bf16 %v135_v4, %v132_v3  ;;  %v90_v16 = vand.u32 4294901760, %v26_v12  ;;  %v93_v17 = vand.u32 4294901760, %v27_v13  ;;  %v5483_v18 = vld [vmem:[%s7306_s3 + $0xa8] sm:$0xff]  ;;  %v144_v19 = vand.u32 4294901760, %v5476_v14  ;;  %v5489_v20 = vld [vmem:[%s7306_s3 + $0x20] sm:$0xff]  ;;  %v5506_v26 = vld [vmem:[%s7306_s3 + $0xb0] sm:$0xff] }
   0x5   :  { %v5494_v21 = vld [vmem:[%s7306_s3 + $0x28] sm:$0xff]  ;;  %v5496_v22 = vpack.c.bf16 %v87_v9, %v84_v6  ;;  %v5498_v23 = vpack.c.bf16 %v141_v11, %v138_v10  ;;  %v147_v24 = vand.u32 4294901760, %v5483_v18  ;;  %v5501_v25 = vsub.f32 %v40_v0, %v132_v3  ;;  %v5511_v27 = vld [vmem:[%s7306_s3 + $0xb8] sm:$0xff]  ;;  %v5535_v36 = vld [vmem:[%s7306_s3 + $0x30] sm:$0xff] }
   0x6   :  { %4521 = vmatprep.subr.bf16.mxu0 %v5478_v15  ;;  %v5514_v28 = vpack.c.bf16 %v93_v17, %v90_v16  ;;  %v5516_v29 = vsub.f32 %v41_v1, %v135_v4  ;;  %v96_v30 = vand.u32 4294901760, %v5489_v20  ;;  %v99_v31 = vand.u32 4294901760, %v5494_v21  ;;  %v5557_v45 = vld [vmem:[%s7306_s3 + $0x38] sm:$0xff]  ;;  %v5587_v58 = vld [vmem:[%s7306_s3 + $0xc0] sm:$0xff] }
   0x7   :  { %4523 = vmatpush3.bf16.msra.mxu0 %v5496_v22  ;;  %v5525_v32 = vpack.c.bf16 %v147_v24, %v144_v19  ;;  %v7323_v33 = vand.u32 4294901760, %v5501_v25  ;;  %v5528_v34 = vsub.f32 %v24_v2, %v84_v6  ;;  %v5530_v35 = vsub.f32 %v25_v5, %v87_v9 }
   0x8   :  { %4525 = vmatprep.subr.bf16.mxu0 %v5498_v23  ;;  %v7322_v37 = vand.u32 4294901760, %v5516_v29  ;;  %v5543_v38 = vpack.c.bf16 %v99_v31, %v96_v30  ;;  %v150_v39 = vand.u32 4294901760, %v5506_v26  ;;  %v153_v40 = vand.u32 4294901760, %v5511_v27 }
   0x9   :  { %v311_v41 = vsub.f32 %v5501_v25, %v7323_v33  ;;  %v7319_v42 = vand.u32 4294901760, %v5528_v34  ;;  %v7318_v43 = vand.u32 4294901760, %v5530_v35  ;;  %v5552_v44 = vsub.f32 %v42_v7, %v138_v10 }
   0xa   :  { %v318_v46 = vsub.f32 %v5516_v29, %v7322_v37  ;;  %v5566_v47 = vpack.c.bf16 %v153_v40, %v150_v39  ;;  %v5568_v48 = vsub.f32 %v43_v8, %v141_v11  ;;  %v102_v49 = vand.u32 4294901760, %v5535_v36 }
   0xb   :  { %4527 = vmatpush3.bf16.msra.mxu0 %v5514_v28  ;;  %v312_v50 = vand.u32 4294901760, %v311_v41  ;;  %v199_v51 = vsub.f32 %v5528_v34, %v7319_v42  ;;  %v206_v52 = vsub.f32 %v5530_v35, %v7318_v43  ;;  %v7317_v53 = vand.u32 4294901760, %v5552_v44 }
   0xc   :  { %4529 = vmatprep.subr.bf16.mxu0 %v5525_v32  ;;  %v319_v54 = vand.u32 4294901760, %v318_v46  ;;  %v7316_v55 = vand.u32 4294901760, %v5568_v48  ;;  %v105_v56 = vand.u32 4294901760, %v5557_v45  ;;  %v5582_v57 = vsub.f32 %v26_v12, %v90_v16 }
   0xd   :  { %13 = vsyncpa [#allocation5], 0  ;;  %v200_v59 = vand.u32 4294901760, %v199_v51  ;;  %v207_v60 = vand.u32 4294901760, %v206_v52  ;;  %v325_v61 = vsub.f32 %v5552_v44, %v7317_v53  ;;  %v5592_v62 = vsub.f32 %v27_v13, %v93_v17  ;;  %v5597_v63 = vld [vmem:[%s7306_s3 + $0xc8] sm:$0xff]  ;;  %v5614_v4 = vld [vmem:[%s7306_s3 + $0x40] sm:$0xff] }
   0xe   :  { %v5599_v0 = vpack.c.bf16 %v319_v54, %v312_v50  ;;  %v332_v1 = vsub.f32 %v5568_v48, %v7316_v55  ;;  %v5608_v2 = vpack.c.bf16 %v105_v56, %v102_v49  ;;  %v7313_v3 = vand.u32 4294901760, %v5582_v57  ;;  %v5619_v5 = vld [vmem:[%s7306_s3 + $0x48] sm:$0xff] }
   0xf   :  { %4531 = vmatpush3.bf16.msra.mxu0 %v5543_v38  ;;  %v5622_v6 = vpack.c.bf16 %v207_v60, %v200_v59  ;;  %v326_v7 = vand.u32 4294901760, %v325_v61  ;;  %v7312_v8 = vand.u32 4294901760, %v5592_v62  ;;  %v156_v9 = vand.u32 4294901760, %v5587_v58 }
  0x10   :  { %7460 = vst [vmem:[#allocation9_spill] sm:$0xff] %v5599_v0  ;;  %4553 = vmatprep.subr.bf16.mxu1 %v5599_v0  ;;  %4533 = vmatprep.subr.bf16.mxu0 %v5566_v47  ;;  %v333_v10 = vand.u32 4294901760, %v332_v1  ;;  %v213_v11 = vsub.f32 %v5582_v57, %v7313_v3  ;;  %v159_v12 = vand.u32 4294901760, %v5597_v63  ;;  %v5635_v13 = vsub.f32 %v5476_v14, %v144_v19  ;;  %v5651_v14 = vld [vmem:[%s7306_s3 + $0xd0] sm:$0xff]  ;;  %v5656_v19 = vld [vmem:[%s7306_s3 + $0xd8] sm:$0xff] }
  0x11   :  { %7461 = vst [vmem:[#allocation10_spill] sm:$0xff] %v5622_v6  ;;  %4555 = vmatpush3.bf16.msra.mxu1 %v5622_v6  ;;  %v220_v16 = vsub.f32 %v5592_v62, %v7312_v8  ;;  %v5644_v17 = vsub.f32 %v5483_v18, %v147_v24  ;;  %v108_v41 = vand.u32 4294901760, %v5614_v4  ;;  %v111_v46 = vand.u32 4294901760, %v5619_v5  ;;  %7462 = vst [vmem:[#allocation11_spill] sm:$0xff] %v5651_v14 }
  0x12   :  { %7463 = vst [vmem:[#allocation12_spill] sm:$0xff] %v5656_v19  ;;  %v5658_v50 = vpack.c.bf16 %v333_v10, %v326_v7  ;;  %v214_v51 = vand.u32 4294901760, %v213_v11  ;;  %v5664_v18 = vpack.c.bf16 %v159_v12, %v156_v9  ;;  %v7310_v24 = vand.u32 4294901760, %v5635_v13 }
  0x13   :  { %4535 = vmatpush3.bf16.msra.mxu0 %v5608_v2  ;;  %v221_v52 = vand.u32 4294901760, %v220_v16  ;;  %v7311_v54 = vand.u32 4294901760, %v5644_v17  ;;  %v5673_v59 = vpack.c.bf16 %v111_v46, %v108_v41  ;;  %v5678_v60 = vsub.f32 %v5489_v20, %v96_v30  ;;  %v5695_v20 = vld [vmem:[%s7306_s3 + $0x50] sm:$0xff] }
  0x14   :  { %7464 = vst [vmem:[#allocation13_spill] sm:$0xff] %v5658_v50  ;;  %4557 = vmatprep.subr.bf16.mxu1 %v5658_v50  ;;  %4537 = vmatprep.subr.bf16.mxu0 %v5664_v18  ;;  %v339_v61 = vsub.f32 %v5635_v13, %v7310_v24  ;;  %v5688_v1 = vsub.f32 %v5494_v21, %v99_v31  ;;  %v7334_v7 = vand.u32 4294901760, %v5651_v14  ;;  %v7330_v10 = vand.u32 4294901760, %v5656_v19  ;;  %v5711_v31 = vld [vmem:[%s7306_s3 + $0x58] sm:$0xff] }
  0x15   :  { %7465 = vst [vmem:[#allocation14_spill] sm:$0xff] %v5695_v20  ;;  %v5697_v30 = vpack.c.bf16 %v221_v52, %v214_v51  ;;  %v346_v11 = vsub.f32 %v5644_v17, %v7311_v54  ;;  %v7314_v16 = vand.u32 4294901760, %v5678_v60  ;;  %v5706_v21 = vsub.f32 %v5506_v26, %v150_v39  ;;  %7467 = vst [vmem:[#allocation16_spill] sm:$0xff] %v5711_v31 }
  0x16   :  { %v340_v24 = vand.u32 4294901760, %v339_v61  ;;  %v7315_v51 = vand.u32 4294901760, %v5688_v1  ;;  %v5718_v52 = vpack.c.bf16 %v7330_v10, %v7334_v7  ;;  %v5723_v54 = vsub.f32 %v5511_v27, %v153_v40 }
  0x17   :  { %7466 = vst [vmem:[#allocation15_spill] sm:$0xff] %v5697_v30  ;;  %4559 = vmatpush3.bf16.msra.mxu1 %v5697_v30  ;;  %v347_v26 = vand.u32 4294901760, %v346_v11  ;;  %4539 = vmatpush3.bf16.msra.mxu0 %v5673_v59  ;;  %v227_v39 = vsub.f32 %v5678_v60, %v7314_v16  ;;  %v7321_v61 = vand.u32 4294901760, %v5706_v21  ;;  %v7325_v8 = vand.u32 4294901760, %v5695_v20  ;;  %v5746_v16 = vld [vmem:[%s7306_s3 + $0xe0] sm:$0xff] }
  0x18   :  { %v234_v3 = vsub.f32 %v5688_v1, %v7315_v51  ;;  %4541 = vmatprep.subr.bf16.mxu0 %v5718_v52  ;;  %v7320_v27 = vand.u32 4294901760, %v5723_v54  ;;  %v7324_v40 = vand.u32 4294901760, %v5711_v31  ;;  %v5741_v11 = vsub.f32 %v5535_v36, %v102_v49  ;;  %7468 = vst [vmem:[#allocation17_spill] sm:$0xff] %v5746_v16  ;;  %v5751_v51 = vld [vmem:[%s7306_s3 + $0xe8] sm:$0xff] }
  0x19   :  { %7469 = vst [vmem:[#allocation18_spill] sm:$0xff] %v5751_v51  ;;  %v5753_v55 = vpack.c.bf16 %v347_v26, %v340_v24  ;;  %v228_v53 = vand.u32 4294901760, %v227_v39  ;;  %v353_v43 = vsub.f32 %v5706_v21, %v7321_v61  ;;  %v5761_v36 = vsub.f32 %v5557_v45, %v105_v56  ;;  %v5776_v39 = vld [vmem:[%s7306_s3 + $0x60] sm:$0xff]  ;;  %v5785_v61 = vld [vmem:[%s7306_s3 + $0x68] sm:$0xff] }
  0x1a   :  { %v235_v49 = vand.u32 4294901760, %v234_v3  ;;  %v360_v42 = vsub.f32 %v5723_v54, %v7320_v27  ;;  %v5770_v24 = vpack.c.bf16 %v7324_v40, %v7325_v8  ;;  %v7327_v26 = vand.u32 4294901760, %v5741_v11  ;;  %7471 = vst [vmem:[#allocation20_spill] sm:$0xff] %v5776_v39  ;;  %7472 = vst [vmem:[#allocation21_spill] sm:$0xff] %v5785_v61 }
  0x1b   :  { %7470 = vst [vmem:[#allocation19_spill] sm:$0xff] %v5753_v55  ;;  %4561 = vmatprep.subr.bf16.mxu1 %v5753_v55  ;;  %v354_v45 = vand.u32 4294901760, %v353_v43  ;;  %v7326_v56 = vand.u32 4294901760, %v5761_v36  ;;  %v7329_v3 = vand.u32 4294901760, %v5746_v16  ;;  %v7328_v27 = vand.u32 4294901760, %v5751_v51 }
  0x1c   :  { %v5787_v37 = vpack.c.bf16 %v235_v49, %v228_v53  ;;  %v361_v33 = vand.u32 4294901760, %v360_v42  ;;  %4543 = vmatpush3.bf16.msra.mxu0 %v5770_v24  ;;  %v241_v43 = vsub.f32 %v5741_v11, %v7327_v26  ;;  %v5796_v40 = vsub.f32 %v5587_v58, %v156_v9  ;;  %v5816_v58 = vld [vmem:[%s7306_s3 + $0xf0] sm:$0xff]  ;;  %v5821_v9 = vld [vmem:[%s7306_s3 + $0xf8] sm:$0xff] }
  0x1d   :  { %v248_v8 = vsub.f32 %v5761_v36, %v7326_v56  ;;  %v5805_v42 = vpack.c.bf16 %v7328_v27, %v7329_v3  ;;  %v5810_v53 = vsub.f32 %v5597_v63, %v159_v12  ;;  %v7333_v49 = vand.u32 4294901760, %v5776_v39  ;;  %7474 = vst [vmem:[#allocation23_spill] sm:$0xff] %v5816_v58  ;;  %7475 = vst [vmem:[#allocation24_spill] sm:$0xff] %v5821_v9 }
  0x1e   :  { %7473 = vst [vmem:[#allocation22_spill] sm:$0xff] %v5787_v37  ;;  %4563 = vmatpush3.bf16.msra.mxu1 %v5787_v37  ;;  %v5824_v56 = vpack.c.bf16 %v361_v33, %v354_v45  ;;  %v242_v26 = vand.u32 4294901760, %v241_v43  ;;  %v7331_v63 = vand.u32 4294901760, %v5796_v40  ;;  %v7332_v12 = vand.u32 4294901760, %v5785_v61 }
  0x1f   :  { %vm62_vm0 = vcmask 1043456   ;;  %v249_v27 = vand.u32 4294901760, %v248_v8  ;;  %4545 = vmatprep.subr.bf16.mxu0 %v5805_v42  ;;  %v7335_v3 = vand.u32 4294901760, %v5810_v53  ;;  %v5833_v10 = vsub.f32 %v5614_v4, %v108_v41 }
  0x20   :  { %7476 = vst [vmem:[#allocation25_spill] sm:$0xff] %v5824_v56  ;;  %v5838_v33 = vsub.f32 %v5619_v5, %v111_v46  ;;  %4565 = vmatprep.subr.bf16.mxu1 %v5824_v56  ;;  %v367_v8 = vsub.f32 %v5796_v40, %v7331_v63  ;;  %v5848_v45 = vpack.c.bf16 %v7332_v12, %v7333_v49  ;;  %v7339_v4 = vand.u32 4294901760, %v5816_v58  ;;  %v5855_v5 = vld [vmem:[%s7306_s3 + $0x70] sm:$0xff]  ;;  %v5867_v49 = vld [vmem:[%s7306_s3 + $0x78] sm:$0xff] }
  0x21   :  { %v7338_v41 = vand.u32 4294901760, %v5821_v9  ;;  %7478 = vst [vmem:[#allocation27_spill] sm:$0xff] %v5855_v5  ;;  %v5857_v46 = vpack.c.bf16 %v249_v27, %v242_v26  ;;  %v374_v43 = vsub.f32 %v5810_v53, %v7335_v3  ;;  %7480 = vst [vmem:[#allocation29_spill] sm:$0xff] %v5867_v49  ;;  %v7482_v26 = vand.u32 4294901760, %v5651_v14 }
  0x22   :  { %7477 = vst [vmem:[#allocation26_spill] sm:$0xff] %v5848_v45  ;;  %v368_v7 = vand.u32 4294901760, %v367_v8  ;;  %4547 = vmatpush3.bf16.msra.mxu0 %v5848_v45  ;;  %v7483_v12 = vand.u32 4294901760, %v5656_v19  ;;  %v7484_v56 = vand.u32 4294901760, %v5833_v10  ;;  %v7492_v6 = vand.u32 4294901760, %v5855_v5 }
  0x23   :  { %7479 = vst [vmem:[#allocation28_spill] sm:$0xff] %v5857_v46  ;;  %v5874_v27 = vpack.c.bf16 %v7338_v41, %v7339_v4  ;;  %v5879_v3 = vsub.f32 %v5651_v14, %v7482_v26  ;;  %4567 = vmatpush3.bf16.msra.mxu1 %v5857_v46  ;;  %v375_v8 = vand.u32 4294901760, %v374_v43  ;;  %v7485_v41 = vand.u32 4294901760, %v5838_v33 }
  0x24   :  { %v5884_v63 = vsub.f32 %v5656_v19, %v7483_v12  ;;  %v255_v37 = vsub.f32 %v5833_v10, %v7484_v56  ;;  %v7486_v43 = vand.u32 4294901760, %v5695_v20  ;;  %v5906_v56 = vld [vmem:[%s7303_s0] sm:$0xff]  ;;  %v7489_v19 = vand.u32 4294901760, %v5711_v31 }
  0x25   :  { %7481 = vst [vmem:[#allocation30_spill] sm:$0xff] %v5874_v27  ;;  %v262_v4 = vsub.f32 %v5838_v33, %v7485_v41  ;;  %4549 = vmatprep.subr.bf16.mxu0 %v5874_v27  ;;  %v5911_v41 = vld [vmem:[%s7303_s0 + $0x8] sm:$0xff]  ;;  %v5913_v55 = vpack.c.bf16 %v375_v8, %v368_v7  ;;  %v7493_v7 = vand.u32 4294901760, %v5867_v49  ;;  %vm1822_vm1 = vcmask 130048  }
  0x26   :  { %v5901_v14 = vsub.f32 %v5695_v20, %v7486_v43  ;;  %7487 = vst [vmem:[#allocation31_spill] sm:$0xff] %v5911_v41  ;;  %v256_v12 = vand.u32 4294901760, %v255_v37  ;;  %v5918_v46 = vsub.f32 %v5711_v31, %v7489_v19  ;;  %v7490_v43 = vand.u32 4294901760, %v5879_v3 }
  0x27   :  { %7488 = vst [vmem:[#allocation32_spill] sm:$0xff] %v5913_v55  ;;  %v263_v26 = vand.u32 4294901760, %v262_v4  ;;  %v7491_v30 = vand.u32 4294901760, %v5884_v63  ;;  %v5930_v8 = vpack.c.bf16 %v7493_v7, %v7492_v6  ;;  %4569 = vmatprep.subr.bf16.mxu1 %v5913_v55  ;;  %v7496_v7 = vand.u32 4294901760, %v5746_v16 }
  0x28   :  { %v381_v20 = vsub.f32 %v5879_v3, %v7490_v43  ;;  %v7353_v37 = vand.u32 4294901760, %v5901_v14  ;;  %v7360_v4 = vand.u32 4294901760, %v5918_v46  ;;  %v58_v43 = vcombine.high %v5906_v56, %v5906_v56 }
  0x29   :  { %v388_v50 = vsub.f32 %v5884_v63, %v7491_v30  ;;  %7494 = vst [vmem:[#allocation33_spill] sm:$0xff] %v5930_v8  ;;  %v5934_v19 = vpack.c.bf16 %v263_v26, %v256_v12  ;;  %v59_v30 = vcombine.high %v5911_v41, %v5911_v41  ;;  %4551 = vmatpush3.bf16.msra.mxu0 %v5930_v8  ;;  %v7497_v55 = vand.u32 4294901760, %v5751_v51 }
  0x2a   :  { %v382_v31 = vand.u32 4294901760, %v381_v20  ;;  %v269_v6 = vsub.f32 %v5901_v14, %v7353_v37  ;;  %v5948_v26 = vsub.f32 %v5746_v16, %v7496_v7  ;;  %v276_v12 = vsub.f32 %v5918_v46, %v7360_v4 }
  0x2b   :  { %7495 = vst [vmem:[#allocation34_spill] sm:$0xff] %v5934_v19  ;;  %v389_v0 = vand.u32 4294901760, %v388_v50  ;;  %4571 = vmatpush3.bf16.msra.mxu1 %v5934_v19  ;;  %v66_v20 = vsel %vm62_vm0, %v58_v43, 0.0  ;;  %v67_v50 = vsel %vm62_vm0, %v59_v30, 0.0  ;;  %v5959_v8 = vsub.f32 %v5751_v51, %v7497_v55 }
  0x2c   :  { %v270_v27 = vand.u32 4294901760, %v269_v6  ;;  %v68_v7 = vadd.f32 %v67_v50, %v66_v20  ;;  %v7362_v16 = vand.u32 4294901760, %v5948_v26  ;;  %v277_v19 = vand.u32 4294901760, %v276_v12 }
  0x2d   :  { %v5961_v37 = vpack.c.bf16 %v389_v0, %v382_v31  ;;  %v7365_v45 = vand.u32 4294901760, %v5959_v8  ;;  %v5967_v4 = vpack.c.bf16 %v5516_v29, %v5501_v25  ;;  %v63_v43 = vsel %vm62_vm0, %v5906_v56, 0.0 }
  0x2e   :  { %v5972_v55 = vand.u32 4294901760, %v68_v7  ;;  %v395_v0 = vsub.f32 %v5948_v26, %v7362_v16  ;;  %v64_v31 = vsel %vm62_vm0, %v5911_v41, 0.0  ;;  %v7501_v30 = vand.u32 4294901760, %v5776_v39 }
  0x2f   :  { %7498 = vst [vmem:[#allocation35_spill] sm:$0xff] %v5961_v37  ;;  %7499 = vst [vmem:[#allocation36_spill] sm:$0xff] %v5967_v4  ;;  %4573 = vmatprep.subr.bf16.mxu1 %v5961_v37  ;;  %v5984_v12 = vpack.c.bf16 %v277_v19, %v270_v27  ;;  %v402_v20 = vsub.f32 %v5959_v8, %v7365_v45  ;;  %4585 = vmatprep.subr.bf16.mxu0 %v5967_v4  ;;  %v7503_v51 = vand.u32 4294901760, %v5785_v61  ;;  %vm1812_vm2 = vcmask 125952  }
  0x30   :  { %7500 = vst [vmem:[#allocation37_spill] sm:$0xff] %v5972_v55  ;;  %v5982_v6 = vsub.f32 %v5776_v39, %v7501_v30  ;;  %v65_v50 = vadd.f32 %v64_v31, %v63_v43  ;;  %v5996_v37 = vsub.f32 %v68_v7, %v5972_v55  ;;  %v396_v41 = vand.u32 4294901760, %v395_v0  ;;  %420 = vmatprep.mubr.f32.mxu1 %v5972_v55 }
  0x31   :  { %7502 = vst [vmem:[#allocation38_spill] sm:$0xff] %v5984_v12  ;;  %v5993_v16 = vsub.f32 %v5785_v61, %v7503_v51  ;;  %4575 = vmatpush3.bf16.msra.mxu1 %v5984_v12  ;;  %v403_v27 = vand.u32 4294901760, %v402_v20  ;;  %v7504_v31 = vand.u32 4294901760, %v5816_v58  ;;  %v7505_v45 = vand.u32 4294901760, %v5821_v9 }
  0x32   :  { %v7369_v30 = vand.u32 4294901760, %v5982_v6  ;;  %v6001_v19 = vand.u32 4294901760, %v65_v50 }
  0x33   :  { %v6007_v51 = vsub.f32 %v5816_v58, %v7504_v31  ;;  %v6016_v61 = vsub.f32 %v5821_v9, %v7505_v45  ;;  %v6018_v20 = vpack.c.bf16 %v403_v27, %v396_v41  ;;  %v7507_v39 = vand.u32 4294901760, %v5993_v16 }
  0x34   :  { %v283_v0 = vsub.f32 %v5982_v6, %v7369_v30  ;;  %v6021_v43 = vsub.f32 %v65_v50, %v6001_v19  ;;  %v7508_v58 = vand.u32 4294901760, %v5996_v37  ;;  %v7509_v45 = vand.u32 4294901760, %v5855_v5 }
  0x35   :  { %7506 = vst [vmem:[#allocation39_spill] sm:$0xff] %v6018_v20  ;;  %v290_v31 = vsub.f32 %v5993_v16, %v7507_v39  ;;  %v7377_v7 = vand.u32 4294901760, %v6007_v51  ;;  %v7378_v12 = vand.u32 4294901760, %v6016_v61  ;;  %4577 = vmatprep.subr.bf16.mxu1 %v6018_v20  ;;  %v7510_v9 = vand.u32 4294901760, %v5867_v49 }
  0x36   :  { %v182_v30 = vsub.f32 %v5996_v37, %v7508_v58  ;;  %v284_v4 = vand.u32 4294901760, %v283_v0  ;;  %v6034_v41 = vsub.f32 %v5855_v5, %v7509_v45  ;;  %v7382_v50 = vand.u32 4294901760, %v6021_v43 }
  0x37   :  { %v291_v27 = vand.u32 4294901760, %v290_v31  ;;  %v409_v39 = vsub.f32 %v6007_v51, %v7377_v7  ;;  %v6044_v58 = vsub.f32 %v5867_v49, %v7510_v9  ;;  %v416_v45 = vsub.f32 %v6016_v61, %v7378_v12 }
  0x38   :  { %v183_v0 = vand.u32 4294901760, %v182_v30  ;;  %v7380_v5 = vand.u32 4294901760, %v6034_v41  ;;  %v188_v31 = vsub.f32 %v6021_v43, %v7382_v50  ;;  %v6058_v9 = vpack.c.bf16 %v5530_v35, %v5528_v34 }
  0x39   :  { %v6053_v20 = vpack.c.bf16 %v291_v27, %v284_v4  ;;  %v410_v55 = vand.u32 4294901760, %v409_v39  ;;  %v7381_v7 = vand.u32 4294901760, %v6044_v58  ;;  %v417_v30 = vand.u32 4294901760, %v416_v45 }
  0x3a   :  { %184 = vmatprep.mubr.f32.mxu0 %v183_v0  ;;  %7512 = vst [vmem:[#allocation41_spill] sm:$0xff] %v6058_v9  ;;  %v297_v12 = vsub.f32 %v6034_v41, %v7380_v5  ;;  %v189_v49 = vand.u32 4294901760, %v188_v31  ;;  %v6066_v4 = vpack.c.bf16 %v5568_v48, %v5552_v44  ;;  %v6077_v31 = vpack.c.bf16 %v5592_v62, %v5582_v57 }
  0x3b   :  { %7511 = vst [vmem:[#allocation40_spill] sm:$0xff] %v6053_v20  ;;  %4579 = vmatpush3.bf16.msra.mxu1 %v6053_v20  ;;  %v304_v27 = vsub.f32 %v6044_v58, %v7381_v7  ;;  %v6071_v39 = vpack.c.bf16 %v417_v30, %v410_v55  ;;  %v6081_v5 = vpack.c.bf16 %v5644_v17, %v5635_v13  ;;  %v7515_v55 = vand.u32 4294901760, %v5501_v25 }
  0x3c   :  { %7513 = vst [vmem:[#allocation42_spill] sm:$0xff] %v6066_v4  ;;  %v298_v0 = vand.u32 4294901760, %v297_v12  ;;  %190 = vmatmul.mubr.f32.vlgmr.msra.gmra.mrb[0].mxu0 %v189_v49  ;;  %v6085_v7 = vpack.c.bf16 %v5688_v1, %v5678_v60  ;;  %v7516_v12 = vand.u32 4294901760, %v5516_v29  ;;  %v7518_v50 = vand.u32 4294901760, %v5530_v35 }
  0x3d   :  { %7514 = vst [vmem:[#allocation43_spill] sm:$0xff] %v6071_v39  ;;  %v305_v45 = vand.u32 4294901760, %v304_v27  ;;  %4587 = vmatpush3.bf16.msra.mxu0 %v6058_v9  ;;  %4581 = vmatprep.subr.bf16.mxu1 %v6071_v39  ;;  %v7517_v27 = vand.u32 4294901760, %v5528_v34  ;;  %v7519_v9 = vand.u32 4294901760, %v5552_v44  ;;  %v7522_v25 = vand.u32 4294901760, %v5592_v62 }
  0x3e   :  { %4589 = vmatprep.subr.bf16.mxu0 %v6066_v4  ;;  %557 = vmatprep.mubr.f32.mxu0 %v5996_v37  ;;  %v6095_v30 = vpack.c.bf16 %v7516_v12, %v7515_v55  ;;  %v7520_v4 = vand.u32 4294901760, %v5568_v48  ;;  %v7523_v29 = vand.u32 4294901760, %v5635_v13  ;;  %v7524_v34 = vand.u32 4294901760, %v5644_v17 }
  0x3f   :  { %v6088_v49 = vpack.c.bf16 %v305_v45, %v298_v0  ;;  %v6101_v39 = vpack.c.bf16 %v7518_v50, %v7517_v27  ;;  %v7521_v45 = vand.u32 4294901760, %v5582_v57  ;;  %v7525_v35 = vand.u32 4294901760, %v5678_v60 }
  0x40   :  { %v6107_v0 = vpack.c.bf16 %v7520_v4, %v7519_v9  ;;  %v6119_v55 = vpack.c.bf16 %v7524_v34, %v7523_v29  ;;  %v7526_v44 = vand.u32 4294901760, %v5688_v1  ;;  %v7527_v48 = vand.u32 4294901760, %v5706_v21 }
  0x41   :  { %v6113_v20 = vpack.c.bf16 %v7522_v25, %v7521_v45  ;;  %4583 = vmatpush3.bf16.msra.mxu1 %v6088_v49  ;;  %v7528_v57 = vand.u32 4294901760, %v5723_v54  ;;  %v7529_v13 = vand.u32 4294901760, %v5741_v11  ;;  %v7530_v17 = vand.u32 4294901760, %v5761_v36  ;;  %4591 = vmatpush3.bf16.msra.mxu0 %v6077_v31 }
  0x42   :  { %v6125_v50 = vpack.c.bf16 %v7526_v44, %v7525_v35  ;;  %v7531_v60 = vand.u32 4294901760, %v5796_v40  ;;  %v7532_v1 = vand.u32 4294901760, %v5810_v53  ;;  %v7533_v12 = vand.u32 4294901760, %v5833_v10  ;;  %4617 = vmatprep.subr.bf16.mxu1 %v5478_v15  ;;  %4593 = vmatprep.subr.bf16.mxu0 %v6081_v5 }
  0x43   :  { %v6132_v62 = vpack.c.bf16 %v7528_v57, %v7527_v48  ;;  %v6138_v9 = vpack.c.bf16 %v7530_v17, %v7529_v13  ;;  %v7534_v27 = vand.u32 4294901760, %v5838_v33  ;;  %v7535_v25 = vand.u32 4294901760, %v5879_v3 }
  0x44   :  { %v6144_v4 = vpack.c.bf16 %v7532_v1, %v7531_v60  ;;  %v7536_v29 = vand.u32 4294901760, %v5884_v63  ;;  %v7537_v35 = vand.u32 4294901760, %v5901_v14  ;;  %v7538_v44 = vand.u32 4294901760, %v5918_v46  ;;  %422 = vmatmul.mubr.f32.vlgmr.msra.gmra.mrb[0].mxu1 %v6001_v19 }
  0x45   :  { %v6150_v45 = vpack.c.bf16 %v7534_v27, %v7533_v12  ;;  %v7539_v57 = vand.u32 4294901760, %v5948_v26  ;;  %v7540_v13 = vand.u32 4294901760, %v5959_v8  ;;  %v6175_v60 = vpack.c.bf16 %v5723_v54, %v5706_v21  ;;  %4619 = vmatpush3.bf16.msra.mxu1 %v5496_v22  ;;  %4595 = vmatpush3.bf16.msra.mxu0 %v6085_v7 }
  0x46   :  { %v6158_v34 = vpack.c.bf16 %v7536_v29, %v7535_v25  ;;  %v6164_v48 = vpack.c.bf16 %v7538_v44, %v7537_v35  ;;  %v7541_v1 = vand.u32 4294901760, %v5982_v6  ;;  %v7542_v12 = vand.u32 4294901760, %v5993_v16  ;;  %4621 = vmatprep.subr.bf16.mxu1 %v5498_v23  ;;  %v7548_v29 = vld [vmem:[#allocation33_spill] sm:$0xff] }
  0x47   :  { %v6170_v17 = vpack.c.bf16 %v7540_v13, %v7539_v57  ;;  %v7543_v25 = vand.u32 4294901760, %v5996_v37  ;;  %v6191_v54 = vpack.c.bf16 %v5761_v36, %v5741_v11  ;;  %4597 = vmatprep.subr.bf16.mxu0 %v6175_v60  ;;  %v6196_v21 = vpack.c.bf16 %v5810_v53, %v5796_v40  ;;  %v7544_v53 = vld [vmem:[#allocation31_spill] sm:$0xff] }
  0x48   :  { %v6181_v27 = vpack.c.bf16 %v7542_v12, %v7541_v1  ;;  %v6203_v37 = vpack.c.bf16 %v5838_v33, %v5833_v10  ;;  %v6208_v11 = vpack.c.bf16 %v5884_v63, %v5879_v3  ;;  %v6215_v40 = vpack.c.bf16 %v5918_v46, %v5901_v14  ;;  %v7545_v33 = vld [vmem:[#allocation26_spill] sm:$0xff] }
  0x49   :  { %664 = vmatprep.mubr.f32.mxu1 %v7543_v25  ;;  %4623 = vmatpush3.bf16.msra.mxu1 %v5514_v28  ;;  %v6220_v10 = vpack.c.bf16 %v5959_v8, %v5948_v26  ;;  %v6227_v36 = vpack.c.bf16 %v5993_v16, %v5982_v6  ;;  %v6232_v14 = vpack.c.bf16 %v6016_v61, %v6007_v51  ;;  %v7546_v46 = vld [vmem:[#allocation30_spill] sm:$0xff]  ;;  %v7547_v8 = vld [vmem:[#allocation37_spill] sm:$0xff]  ;;  %v7550_v1 = vand.u32 4294901760, %v6007_v51 }
  0x4a   :  { %4599 = vmatpush3.bf16.msra.mxu0 %v6191_v54  ;;  %4625 = vmatprep.subr.bf16.mxu1 %v5525_v32  ;;  %v6239_v3 = vpack.c.bf16 %v6044_v58, %v6034_v41  ;;  %v69_v16 = vmul.f32 %v5906_v56, %v5906_v56  ;;  %v70_v63 = vmul.f32 %v7544_v53, %v7544_v53  ;;  %v7549_v56 = vand.u32 4294901760, %v6021_v43 }
  0x4b   :  { %4601 = vmatprep.subr.bf16.mxu0 %v6196_v21  ;;  %v7551_v12 = vand.u32 4294901760, %v6016_v61 }
  0x4c   :  { %v73_v26 = vcombine.high %v69_v16, %v69_v16  ;;  %v74_v6 = vcombine.high %v70_v63, %v70_v63 }
  0x4d   :  { %4627 = vmatpush3.bf16.msra.mxu1 %v5543_v38  ;;  %v6290_v25 = vpack.c.bf16 %v7551_v12, %v7550_v1  ;;  %v7557_v1 = vld [vmem:[#allocation15_spill] sm:$0xff] }
  0x4e   :  { %4603 = vmatpush3.bf16.msra.mxu0 %v6203_v37  ;;  %4629 = vmatprep.subr.bf16.mxu1 %v5566_v47  ;;  %v80_v35 = vsel %vm62_vm0, %v73_v26, 0.0  ;;  %v81_v44 = vsel %vm62_vm0, %v74_v6, 0.0  ;;  %v7553_v26 = vand.u32 4294901760, %v6044_v58  ;;  %v77_v58 = vsel %vm62_vm0, %v69_v16, 0.0 }
  0x4f   :  { %4605 = vmatprep.subr.bf16.mxu0 %v6208_v11  ;;  %v82_v57 = vadd.f32 %v81_v44, %v80_v35  ;;  %v7555_v35 = vld [vmem:[#allocation10_spill] sm:$0xff] }
  0x51   :  { %4631 = vmatpush3.bf16.msra.mxu1 %v5608_v2 }
  0x52   :  { %4607 = vmatpush3.bf16.msra.mxu0 %v6215_v40  ;;  %4633 = vmatprep.subr.bf16.mxu1 %v5664_v18 }
  0x53   :  { %4609 = vmatprep.subr.bf16.mxu0 %v6220_v10 }
  0x55   :  { %4635 = vmatpush3.bf16.msra.mxu1 %v5673_v59 }
  0x56   :  { %4611 = vmatpush3.bf16.msra.mxu0 %v6227_v36  ;;  %4637 = vmatprep.subr.bf16.mxu1 %v5718_v52 }
  0x57   :  { %4613 = vmatprep.subr.bf16.mxu0 %v6232_v14 }
  0x59   :  { %4639 = vmatpush3.bf16.msra.mxu1 %v5770_v24 }
  0x5a   :  { %4615 = vmatpush3.bf16.msra.mxu0 %v6239_v3  ;;  %4641 = vmatprep.subr.bf16.mxu1 %v5805_v42 }
  0x5b   :  { %4649 = vmatprep.subr.bf16.mxu0 %v6095_v30 }
  0x5d   :  { %560 = vmatmul.mubr.f32.vlgmr.msra.gmra.mrb[2].mxu0 %v6021_v43  ;;  %4643 = vmatpush3.bf16.msra.mxu1 %v7545_v33  ;;  %v6273_v43 = vand.u32 4294901760, %v82_v57 }
  0x5e   :  { %4651 = vmatpush3.bf16.msra.mxu0 %v6101_v39  ;;  %4645 = vmatprep.subr.bf16.mxu1 %v7546_v46 }
  0x5f   :  { %4653 = vmatprep.subr.bf16.mxu0 %v6107_v0  ;;  %834 = vmatprep.mubr.f32.mxu0 %v7547_v8  ;;  %v6280_v13 = vsub.f32 %v82_v57, %v6273_v43  ;;  %v7556_v57 = vld [vmem:[#allocation13_spill] sm:$0xff] }
  0x61   :  { %4647 = vmatpush3.bf16.msra.mxu1 %v7548_v29  ;;  %v1043_v53 = vand.u32 4294901760, %v6280_v13 }
  0x62   :  { %4655 = vmatpush3.bf16.msra.mxu0 %v6113_v20  ;;  %4681 = vmatprep.subr.bf16.mxu1 %v5478_v15 }
  0x63   :  { %4657 = vmatprep.subr.bf16.mxu0 %v6119_v55  ;;  %v1044_v61 = vsub.f32 %v6280_v13, %v1043_v53 }
  0x64   :  { %668 = vmatmul.mubr.f32.vlgmr.msra.gmra.mrb[2].mxu1 %v7549_v56  ;;  %v78_v56 = vsel %vm62_vm0, %v70_v63, 0.0  ;;  %v7558_v63 = vld [vmem:[#allocation19_spill] sm:$0xff] }
  0x65   :  { %4683 = vmatpush3.bf16.msra.mxu1 %v5496_v22  ;;  %938 = vmatprep.mubr.f32.mxu1 %v7547_v8  ;;  %v7552_v8 = vand.u32 4294901760, %v6034_v41  ;;  %v1045_v51 = vand.u32 4294901760, %v1044_v61  ;;  %v7554_v41 = vld [vmem:[#allocation9_spill] sm:$0xff]  ;;  %v79_v44 = vadd.f32 %v78_v56, %v77_v58  ;;  %v7564_v56 = vld [vmem:[#allocation35_spill] sm:$0xff] }
  0x66   :  { %4659 = vmatpush3.bf16.msra.mxu0 %v6125_v50  ;;  %4685 = vmatprep.subr.bf16.mxu1 %v5498_v23 }
  0x67   :  { %4661 = vmatprep.subr.bf16.mxu0 %v6132_v62  ;;  %v6300_v6 = vpack.c.bf16 %v7553_v26, %v7552_v8  ;;  %v6328_v16 = vand.u32 4294901760, %v79_v44  ;;  %v7560_v8 = vld [vmem:[#allocation25_spill] sm:$0xff]  ;;  %v7561_v26 = vld [vmem:[#allocation28_spill] sm:$0xff] }
  0x69   :  { %4687 = vmatpush3.bf16.msra.mxu1 %v5514_v28  ;;  %v6335_v12 = vsub.f32 %v79_v44, %v6328_v16 }
  0x6a   :  { %4663 = vmatpush3.bf16.msra.mxu0 %v6138_v9  ;;  %4689 = vmatprep.subr.bf16.mxu1 %v5525_v32 }
  0x6b   :  { %4665 = vmatprep.subr.bf16.mxu0 %v6144_v4  ;;  %v1049_v61 = vand.u32 4294901760, %v6335_v12 }
  0x6d   :  { %4691 = vmatpush3.bf16.msra.mxu1 %v5543_v38  ;;  %v1050_v58 = vsub.f32 %v6335_v12, %v1049_v61 }
  0x6e   :  { %4667 = vmatpush3.bf16.msra.mxu0 %v6150_v45  ;;  %4693 = vmatprep.subr.bf16.mxu1 %v5566_v47 }
  0x6f   :  { %4669 = vmatprep.subr.bf16.mxu0 %v6158_v34  ;;  %v1051_v44 = vand.u32 4294901760, %v1050_v58 }
  0x71   :  { %4695 = vmatpush3.bf16.msra.mxu1 %v5608_v2 }
  0x72   :  { %4671 = vmatpush3.bf16.msra.mxu0 %v6164_v48  ;;  %4697 = vmatprep.subr.bf16.mxu1 %v5664_v18 }
  0x73   :  { %4673 = vmatprep.subr.bf16.mxu0 %v6170_v17 }
  0x75   :  { %4699 = vmatpush3.bf16.msra.mxu1 %v5673_v59 }
  0x76   :  { %4675 = vmatpush3.bf16.msra.mxu0 %v6181_v27  ;;  %4701 = vmatprep.subr.bf16.mxu1 %v5718_v52 }
  0x77   :  { %4677 = vmatprep.subr.bf16.mxu0 %v6290_v25 }
  0x79   :  { %4703 = vmatpush3.bf16.msra.mxu1 %v5770_v24 }
  0x7a   :  { %4679 = vmatpush3.bf16.msra.mxu0 %v6300_v6  ;;  %4705 = vmatprep.subr.bf16.mxu1 %v5805_v42 }
  0x7b   :  { %4713 = vmatprep.subr.bf16.mxu0 %v5478_v15 }
  0x7d   :  { %836 = vmatmul.mubr.f32.vlgmr.msra.gmra.mrb[4].mxu0 %v6001_v19  ;;  %4707 = vmatpush3.bf16.msra.mxu1 %v7545_v33 }
  0x7e   :  { %4715 = vmatpush3.bf16.msra.mxu0 %v5496_v22  ;;  %4709 = vmatprep.subr.bf16.mxu1 %v7546_v46 }
  0x7f   :  { %4717 = vmatprep.subr.bf16.mxu0 %v5498_v23  ;;  %1046 = vmatprep.mubr.f32.mxu0 %v1045_v51  ;;  %v7562_v51 = vld [vmem:[#allocation32_spill] sm:$0xff] }
  0x81   :  { %4711 = vmatpush3.bf16.msra.mxu1 %v7548_v29 }
  0x82   :  { %4719 = vmatpush3.bf16.msra.mxu0 %v5514_v28  ;;  %4745 = vmatprep.subr.bf16.mxu1 %v7554_v41  ;;  %v7563_v41 = vld [vmem:[#allocation34_spill] sm:$0xff] }
  0x83   :  { %4721 = vmatprep.subr.bf16.mxu0 %v5525_v32 }
  0x84   :  { %940 = vmatmul.mubr.f32.vlgmr.msra.gmra.mrb[4].mxu1 %v6001_v19  ;;  %v7559_v19 = vld [vmem:[#allocation22_spill] sm:$0xff] }
  0x85   :  { %4747 = vmatpush3.bf16.msra.mxu1 %v7555_v35  ;;  %1282 = vmatprep.mubr.f32.mxu1 %v6273_v43  ;;  %v7565_v35 = vld [vmem:[#allocation38_spill] sm:$0xff] }
  0x86   :  { %4723 = vmatpush3.bf16.msra.mxu0 %v5543_v38  ;;  %4749 = vmatprep.subr.bf16.mxu1 %v7556_v57  ;;  %v7566_v57 = vld [vmem:[#allocation39_spill] sm:$0xff] }
  0x87   :  { %4725 = vmatprep.subr.bf16.mxu0 %v5566_v47 }
  0x89   :  { %4751 = vmatpush3.bf16.msra.mxu1 %v7557_v1  ;;  %v7567_v1 = vld [vmem:[#allocation36_spill] sm:$0xff] }
  0x8a   :  { %4727 = vmatpush3.bf16.msra.mxu0 %v5608_v2  ;;  %4753 = vmatprep.subr.bf16.mxu1 %v7558_v63  ;;  %v7568_v63 = vld [vmem:[#allocation40_spill] sm:$0xff] }
  0x8b   :  { %4729 = vmatprep.subr.bf16.mxu0 %v5664_v18 }
  0x8d   :  { %4755 = vmatpush3.bf16.msra.mxu1 %v7559_v19  ;;  %v7569_v19 = vld [vmem:[#allocation41_spill] sm:$0xff] }
  0x8e   :  { %4731 = vmatpush3.bf16.msra.mxu0 %v5673_v59  ;;  %4757 = vmatprep.subr.bf16.mxu1 %v7560_v8  ;;  %v7570_v8 = vld [vmem:[#allocation43_spill] sm:$0xff] }
  0x8f   :  { %4733 = vmatprep.subr.bf16.mxu0 %v5718_v52 }
  0x91   :  { %4759 = vmatpush3.bf16.msra.mxu1 %v7561_v26  ;;  %v7571_v26 = vld [vmem:[#allocation42_spill] sm:$0xff] }
  0x92   :  { %4735 = vmatpush3.bf16.msra.mxu0 %v5770_v24  ;;  %4761 = vmatprep.subr.bf16.mxu1 %v7562_v51 }
  0x93   :  { %4737 = vmatprep.subr.bf16.mxu0 %v5805_v42 }
  0x95   :  { %4763 = vmatpush3.bf16.msra.mxu1 %v7563_v41  ;;  %v5330_v41 = vld [vmem:[%s7306_s3 + $0xb8] sm:$0xff] }
  0x96   :  { %4739 = vmatpush3.bf16.msra.mxu0 %v7545_v33  ;;  %4765 = vmatprep.subr.bf16.mxu1 %v7564_v56  ;;  %v6571_v58 = vsel %vm1822_vm1, %v5330_v41, 0 }
  0x97   :  { %4741 = vmatprep.subr.bf16.mxu0 %v7546_v46 }
  0x99   :  { %4767 = vmatpush3.bf16.msra.mxu1 %v7565_v35 }
  0x9a   :  { %4743 = vmatpush3.bf16.msra.mxu0 %v7548_v29  ;;  %4769 = vmatprep.subr.bf16.mxu1 %v7566_v57  ;;  %v5331_v57 = vld [vmem:[%s7306_s3 + $0x30] sm:$0xff] }
  0x9b   :  { %4777 = vmatprep.subr.bf16.mxu0 %v7567_v1  ;;  %v6579_v1 = vsel %vm1822_vm1, %v5331_v57, 0 }
  0x9d   :  { %1052 = vmatmul.mubr.f32.vlgmr.msra.gmra.mrb[6].mxu0 %v1051_v44  ;;  %4771 = vmatpush3.bf16.msra.mxu1 %v7568_v63  ;;  %v7403_v44 = vand.u32 4294901760, %v6571_v58  ;;  %v5332_v63 = vld [vmem:[%s7306_s3 + $0x38] sm:$0xff] }
  0x9e   :  { %4779 = vmatpush3.bf16.msra.mxu0 %v7569_v19  ;;  %4773 = vmatprep.subr.bf16.mxu1 %v7570_v8  ;;  %v6585_v19 = vsel %vm1822_vm1, %v5332_v63, 0  ;;  %v7402_v8 = vand.u32 4294901760, %v6579_v1 }
  0x9f   :  { %4781 = vmatprep.subr.bf16.mxu0 %v7571_v26  ;;  %1419 = vmatprep.mubr.f32.mxu0 %v6280_v13 }
  0xa1   :  { %4775 = vmatpush3.bf16.msra.mxu1 %v6088_v49 }
  0xa2   :  { %4783 = vmatpush3.bf16.msra.mxu0 %v6077_v31  ;;  %4809 = vmatprep.subr.bf16.mxu1 %v5478_v15 }
  0xa3   :  { %4785 = vmatprep.subr.bf16.mxu0 %v6081_v5 }
  0xa4   :  { %1284 = vmatmul.mubr.f32.vlgmr.msra.gmra.mrb[6].mxu1 %v6328_v16 }
  0xa5   :  { %4811 = vmatpush3.bf16.msra.mxu1 %v5496_v22  ;;  %1526 = vmatprep.mubr.f32.mxu1 %v1043_v53 }
  0xa6   :  { %4787 = vmatpush3.bf16.msra.mxu0 %v6085_v7  ;;  %4813 = vmatprep.subr.bf16.mxu1 %v5498_v23  ;;  %v5320_v7 = vld [vmem:[%s7306_s3 + $0x8] sm:$0xff] }
  0xa7   :  { %4789 = vmatprep.subr.bf16.mxu0 %v6175_v60 }
  0xa9   :  { %4815 = vmatpush3.bf16.msra.mxu1 %v5514_v28 }
  0xaa   :  { %4791 = vmatpush3.bf16.msra.mxu0 %v6191_v54  ;;  %4817 = vmatprep.subr.bf16.mxu1 %v5525_v32 }
  0xab   :  { %4793 = vmatprep.subr.bf16.mxu0 %v6196_v21  ;;  %v5326_v21 = vld [vmem:[%s7306_s3 + $0xa8] sm:$0xff] }
  0xad   :  { %4819 = vmatpush3.bf16.msra.mxu1 %v5543_v38 }
  0xae   :  { %4795 = vmatpush3.bf16.msra.mxu0 %v6203_v37  ;;  %4821 = vmatprep.subr.bf16.mxu1 %v5566_v47  ;;  %v6507_v37 = vsel %vm1822_vm1, %v5326_v21, 0 }
  0xaf   :  { %4797 = vmatprep.subr.bf16.mxu0 %v6208_v11 }
  0xb1   :  { %4823 = vmatpush3.bf16.msra.mxu1 %v5608_v2 }
  0xb2   :  { %4799 = vmatpush3.bf16.msra.mxu0 %v6215_v40  ;;  %4825 = vmatprep.subr.bf16.mxu1 %v5664_v18 }
  0xb3   :  { %4801 = vmatprep.subr.bf16.mxu0 %v6220_v10 }
  0xb5   :  { %4827 = vmatpush3.bf16.msra.mxu1 %v5673_v59 }
  0xb6   :  { %4803 = vmatpush3.bf16.msra.mxu0 %v6227_v36  ;;  %4829 = vmatprep.subr.bf16.mxu1 %v5718_v52 }
  0xb7   :  { %4805 = vmatprep.subr.bf16.mxu0 %v6232_v14  ;;  %v7389_v14 = vand.u32 4294901760, %v6507_v37 }
  0xb9   :  { %4831 = vmatpush3.bf16.msra.mxu1 %v5770_v24 }
  0xba   :  { %4807 = vmatpush3.bf16.msra.mxu0 %v6239_v3  ;;  %4833 = vmatprep.subr.bf16.mxu1 %v5805_v42 }
  0xbb   :  { %4841 = vmatprep.subr.bf16.mxu0 %v6095_v30  ;;  %v5321_v30 = vld [vmem:[%s7306_s3 + $0x90] sm:$0xff] }
  0xbd   :  { %1422 = vmatmul.mubr.f32.vlgmr.msra.gmra.mrb[8].mxu0 %v6335_v12  ;;  %4835 = vmatpush3.bf16.msra.mxu1 %v7545_v33 }
  0xbe   :  { %4843 = vmatpush3.bf16.msra.mxu0 %v6101_v39  ;;  %4837 = vmatprep.subr.bf16.mxu1 %v7546_v46 }
  0xbf   :  { %4845 = vmatprep.subr.bf16.mxu0 %v6107_v0  ;;  %1696 = vmatprep.mubr.f32.mxu0 %v6273_v43  ;;  %v6461_v0 = vsel %vm1822_vm1, %v5321_v30, 0 }
  0xc1   :  { %4839 = vmatpush3.bf16.msra.mxu1 %v7548_v29 }
  0xc2   :  { %4847 = vmatpush3.bf16.msra.mxu0 %v6113_v20  ;;  %4873 = vmatprep.subr.bf16.mxu1 %v5478_v15  ;;  %v6453_v20 = vsel %vm1822_vm1, %v5320_v7, 0 }
  0xc3   :  { %4849 = vmatprep.subr.bf16.mxu0 %v6119_v55  ;;  %v1926_v49 = vand.u32 4294901760, %v6453_v20 }
  0xc4   :  { %1530 = vmatmul.mubr.f32.vlgmr.msra.gmra.mrb[8].mxu1 %v1049_v61  ;;  %v5329_v61 = vld [vmem:[%s7306_s3 + $0xb0] sm:$0xff] }
  0xc5   :  { %4875 = vmatpush3.bf16.msra.mxu1 %v5496_v22  ;;  %1800 = vmatprep.mubr.f32.mxu1 %v6273_v43  ;;  %v5328_v43 = vld [vmem:[%s7306_s3 + $0x28] sm:$0xff]  ;;  %v6565_v51 = vsel %vm1822_vm1, %v5329_v61, 0 }
  0xc6   :  { %4851 = vmatpush3.bf16.msra.mxu0 %v6125_v50  ;;  %4877 = vmatprep.subr.bf16.mxu1 %v5498_v23  ;;  %v5322_v50 = vld [vmem:[%s7306_s3 + $0x98] sm:$0xff]  ;;  %v6545_v13 = vsel %vm1822_vm1, %v5328_v43, 0  ;;  %v7406_v35 = vand.u32 4294901760, %v6565_v51  ;;  %v7575_v61 = vld [vmem:[#allocation11_spill] sm:$0xff] }
  0xc7   :  { %4853 = vmatprep.subr.bf16.mxu0 %v6132_v62  ;;  %v6473_v62 = vsel %vm1822_vm1, %v5322_v50, 0  ;;  %v7387_v53 = vand.u32 4294901760, %v6545_v13  ;;  %v5335_v50 = vld [vmem:[%s7306_s3 + $0x40] sm:$0xff]  ;;  %v6651_v41 = vsel %vm1822_vm1, %v7575_v61, 0 }
  0xc8   :  { %v7394_v63 = vand.u32 4294901760, %v6651_v41 }
  0xc9   :  { %4879 = vmatpush3.bf16.msra.mxu1 %v5514_v28 }
  0xca   :  { %4855 = vmatpush3.bf16.msra.mxu0 %v6138_v9  ;;  %4881 = vmatprep.subr.bf16.mxu1 %v5525_v32  ;;  %v1977_v9 = vand.u32 4294901760, %v6461_v0 }
  0xcb   :  { %4857 = vmatprep.subr.bf16.mxu0 %v6144_v4  ;;  %v5323_v4 = vld [vmem:[%s7306_s3 + $0x10] sm:$0xff] }
  0xcd   :  { %4883 = vmatpush3.bf16.msra.mxu1 %v5543_v38 }
  0xce   :  { %4859 = vmatpush3.bf16.msra.mxu0 %v6150_v45  ;;  %4885 = vmatprep.subr.bf16.mxu1 %v5566_v47  ;;  %v5317_v47 = vld [vmem:[%s7306_s3 + $0x80] sm:$0xff]  ;;  %v6480_v45 = vsel %vm1822_vm1, %v5323_v4, 0  ;;  %v6623_v4 = vsel %vm1822_vm1, %v5335_v50, 0 }
  0xcf   :  { %4861 = vmatprep.subr.bf16.mxu0 %v6158_v34  ;;  %v7412_v40 = vand.u32 4294901760, %v6480_v45 }
  0xd1   :  { %4887 = vmatpush3.bf16.msra.mxu1 %v5608_v2  ;;  %v6433_v2 = vsel %vm1822_vm1, %v5317_v47, 0  ;;  %v5333_v47 = vld [vmem:[%s7306_s3 + $0xc0] sm:$0xff] }
  0xd2   :  { %4863 = vmatpush3.bf16.msra.mxu0 %v6164_v48  ;;  %4889 = vmatprep.subr.bf16.mxu1 %v5664_v18  ;;  %v5318_v18 = vld [vmem:[%s7306_s3 + $0x88] sm:$0xff]  ;;  %v1980_v48 = vand.u32 4294901760, %v6473_v62 }
  0xd3   :  { %4865 = vmatprep.subr.bf16.mxu0 %v6170_v17  ;;  %v5324_v17 = vld [vmem:[%s7306_s3 + $0x18] sm:$0xff] }
  0xd4   :  { %v6493_v60 = vsel %vm1822_vm1, %v5324_v17, 0  ;;  %v6515_v11 = vpack.c.bf16 %v1980_v48, %v1977_v9  ;;  %v5336_v17 = vld [vmem:[%s7306_s3 + $0x48] sm:$0xff] }
  0xd5   :  { %4891 = vmatpush3.bf16.msra.mxu1 %v5673_v59  ;;  %v6439_v59 = vsel %vm1822_vm1, %v5318_v18, 0  ;;  %v7409_v10 = vand.u32 4294901760, %v6493_v60  ;;  %v6609_v18 = vsel %vm1822_vm1, %v5333_v47, 0 }
  0xd6   :  { %4867 = vmatpush3.bf16.msra.mxu0 %v6181_v27  ;;  %4893 = vmatprep.subr.bf16.mxu1 %v5718_v52  ;;  %v1971_v52 = vand.u32 4294901760, %v6433_v2  ;;  %v5325_v27 = vld [vmem:[%s7306_s3 + $0xa0] sm:$0xff] }
  0xd7   :  { %4869 = vmatprep.subr.bf16.mxu0 %v6290_v25  ;;  %v6501_v54 = vsel %vm1822_vm1, %v5325_v27, 0  ;;  %v6527_v3 = vpack.c.bf16 %v7409_v10, %v7412_v40  ;;  %v6629_v27 = vsel %vm1822_vm1, %v5336_v17, 0  ;;  %v6793_v40 = vsub.f32 %v6473_v62, %v1980_v48 }
  0xd8   :  { %v7390_v36 = vand.u32 4294901760, %v6501_v54  ;;  %v7395_v43 = vand.u32 4294901760, %v6629_v27  ;;  %v7597_v48 = vand.u32 4294901760, %v6579_v1 }
  0xd9   :  { %4895 = vmatpush3.bf16.msra.mxu1 %v5770_v24  ;;  %v1974_v24 = vand.u32 4294901760, %v6439_v59 }
  0xda   :  { %4871 = vmatpush3.bf16.msra.mxu0 %v6300_v6  ;;  %4897 = vmatprep.subr.bf16.mxu1 %v5805_v42  ;;  %v5319_v42 = vld [vmem:[%s7306_s3] sm:$0xff] }
  0xdb   :  { %v6447_v5 = vsel %vm1822_vm1, %v5319_v42, 0  ;;  %v6467_v55 = vpack.c.bf16 %v1974_v24, %v1971_v52  ;;  %v5334_v42 = vld [vmem:[%s7306_s3 + $0xc8] sm:$0xff]  ;;  %v6763_v10 = vsub.f32 %v6439_v59, %v1974_v24 }
  0xdc   :  { %v1923_v31 = vand.u32 4294901760, %v6447_v5  ;;  %v6615_v7 = vsel %vm1822_vm1, %v5334_v42, 0 }
  0xdd   :  { %1698 = vmatmul.mubr.f32.vlgmr.msra.gmra.mrb[10].mxu0 %v6328_v16  ;;  %4899 = vmatpush3.bf16.msra.mxu1 %v7545_v33  ;;  %v6533_v33 = vpack.c.bf16 %v7389_v14, %v7390_v36  ;;  %v7397_v30 = vand.u32 4294901760, %v6615_v7 }
  0xde   :  { %4901 = vmatprep.subr.bf16.mxu1 %v7546_v46  ;;  %v6486_v34 = vpack.c.bf16 %v1926_v49, %v1923_v31  ;;  %4905 = vmatprep.subr.bf16.mxu0 %v6467_v55  ;;  %v5327_v46 = vld [vmem:[%s7306_s3 + $0x20] sm:$0xff] }
  0xe1   :  { %4903 = vmatpush3.bf16.msra.mxu1 %v7548_v29  ;;  %v6539_v29 = vsel %vm1822_vm1, %v5327_v46, 0  ;;  %v7396_v46 = vand.u32 4294901760, %v6623_v4 }
  0xe2   :  { %5097 = vmatprep.subr.bf16.mxu1 %v6467_v55  ;;  %v7388_v25 = vand.u32 4294901760, %v6539_v29 }
  0xe3   :  { %4907 = vmatpush3.bf16.xpose.msra.mxu0 %v6486_v34 }
  0xe4   :  { %1802 = vmatmul.mubr.f32.vlgmr.msra.gmra.mrb[10].mxu1 %v6328_v16  ;;  %4909 = vmatprep.subr.bf16.mxu0 %v6515_v11  ;;  %v6557_v6 = vpack.c.bf16 %v7387_v53, %v7388_v25  ;;  %v7583_v25 = vld [vmem:[#allocation20_spill] sm:$0xff] }
  0xe5   :  { %v6691_v14 = vsel %vm1822_vm1, %v7583_v25, 0 }
  0xea   :  { %5099 = vmatpush3.bf16.xpose.msra.mxu1 %v6486_v34 }
  0xeb   :  { %5101 = vmatprep.subr.bf16.mxu1 %v6515_v11  ;;  %4911 = vmatpush3.bf16.xpose.msra.mxu0 %v6527_v3 }
  0xec   :  { %4913 = vmatprep.subr.bf16.mxu0 %v6533_v33 }
  0xf2   :  { %5103 = vmatpush3.bf16.xpose.msra.mxu1 %v6527_v3 }
  0xf3   :  { %5105 = vmatprep.subr.bf16.mxu1 %v6533_v33  ;;  %4915 = vmatpush3.bf16.xpose.msra.mxu0 %v6557_v6 }
  0xfa   :  { %5107 = vmatpush3.bf16.xpose.msra.mxu1 %v6557_v6 }
 0x10f   :  { %v3724_v15 = vpop.f32.mrb[0].mxu0 }
 0x110   :  { %v3725_v22 = vpop.f32.mrb[1].mxu0 }
 0x111   :  { %v3726_v23 = vadd.f32 %v3725_v22, %v3724_v15  ;;  %v6592_v15 = vpack.c.bf16 %v7403_v44, %v7406_v35  ;;  %v7401_v22 = vand.u32 4294901760, %v6585_v19 }
 0x113   :  { %4917 = vmatprep.subr.bf16.mxu0 %v6592_v15  ;;  %5109 = vmatprep.subr.bf16.mxu1 %v6592_v15 }
 0x117   :  { %v3759_v28 = vpop.f32.mrb[0].mxu1 }
 0x118   :  { %v3760_v32 = vpop.f32.mrb[1].mxu1 }
 0x119   :  { %v3761_v38 = vadd.f32 %v3760_v32, %v3759_v28 }
 0x11b   :  { %v424_v39 = vadd.f32 %v3761_v38, %v3726_v23  ;;  %v6600_v23 = vpack.c.bf16 %v7401_v22, %v7402_v8  ;;  %v7591_v22 = vld [vmem:[#allocation29_spill] sm:$0xff] }
 0x11c   :  { %v6741_v8 = vsel %vm1822_vm1, %v7591_v22, 0 }
 0x11d   :  { %7572 = vst [vmem:[#allocation31_spill] sm:$0xff] %v6600_v23  ;;  %4919 = vmatpush3.bf16.xpose.msra.mxu0 %v6600_v23  ;;  %5111 = vmatpush3.bf16.xpose.msra.mxu1 %v6600_v23 }
 0x130   :  { %v3794_v16 = vpop.f32.mrb[2].mxu0 }
 0x131   :  { %v3795_v12 = vpop.f32.mrb[3].mxu0 }
 0x132   :  { %v3796_v56 = vadd.f32 %v3795_v12, %v3794_v16  ;;  %v6643_v12 = vpack.c.bf16 %v7395_v43, %v7396_v46 }
 0x134   :  { %v562_v26 = vadd.f32 %v3796_v56, %v424_v39  ;;  %v7400_v39 = vand.u32 4294901760, %v6609_v18  ;;  %7574 = vst [vmem:[#allocation30_spill] sm:$0xff] %v6643_v12  ;;  %v7576_v56 = vld [vmem:[#allocation12_spill] sm:$0xff] }
 0x135   :  { %v6655_v57 = vsel %vm1822_vm1, %v7576_v56, 0  ;;  %v7581_v56 = vld [vmem:[#allocation17_spill] sm:$0xff] }
 0x136   :  { %v6637_v16 = vpack.c.bf16 %v7397_v30, %v7400_v39 }
 0x137   :  { %v3829_v28 = vpop.f32.mrb[2].mxu1 }
 0x138   :  { %v3830_v32 = vpop.f32.mrb[3].mxu1  ;;  %7573 = vst [vmem:[#allocation26_spill] sm:$0xff] %v6637_v16  ;;  %4921 = vmatprep.subr.bf16.mxu0 %v6637_v16  ;;  %5113 = vmatprep.subr.bf16.mxu1 %v6637_v16 }
 0x139   :  { %v3831_v38 = vadd.f32 %v3830_v32, %v3829_v28  ;;  %4923 = vmatpush3.bf16.xpose.msra.mxu0 %v6643_v12  ;;  %5115 = vmatpush3.bf16.xpose.msra.mxu1 %v6643_v12  ;;  %v7577_v28 = vld [vmem:[#allocation14_spill] sm:$0xff] }
 0x13a   :  { %v6661_v32 = vsel %vm1822_vm1, %v7577_v28, 0  ;;  %v6683_v28 = vsel %vm1822_vm1, %v7581_v56, 0 }
 0x13b   :  { %v670_v21 = vadd.f32 %v3831_v38, %v562_v26  ;;  %v7393_v26 = vand.u32 4294901760, %v6655_v57  ;;  %v7578_v38 = vld [vmem:[#allocation16_spill] sm:$0xff]  ;;  %v7392_v42 = vand.u32 4294901760, %v6661_v32  ;;  %v7399_v36 = vand.u32 4294901760, %v6683_v28 }
 0x13c   :  { %v6665_v47 = vsel %vm1822_vm1, %v7578_v38, 0  ;;  %v7582_v38 = vld [vmem:[#allocation18_spill] sm:$0xff] }
 0x13d   :  { %v7391_v50 = vand.u32 4294901760, %v6665_v47  ;;  %v6673_v17 = vpack.c.bf16 %v7393_v26, %v7394_v63  ;;  %v6687_v53 = vsel %vm1822_vm1, %v7582_v38, 0  ;;  %v7585_v26 = vld [vmem:[#allocation23_spill] sm:$0xff]  ;;  %v7586_v63 = vld [vmem:[#allocation24_spill] sm:$0xff] }
 0x13e   :  { %v6703_v38 = vsel %vm1822_vm1, %v7585_v26, 0  ;;  %v6707_v25 = vsel %vm1822_vm1, %v7586_v63, 0 }
 0x13f   :  { %7579 = vst [vmem:[#allocation37_spill] sm:$0xff] %v6673_v17  ;;  %v6679_v61 = vpack.c.bf16 %v7391_v50, %v7392_v42  ;;  %4925 = vmatprep.subr.bf16.mxu0 %v6673_v17  ;;  %5117 = vmatprep.subr.bf16.mxu1 %v6673_v17  ;;  %v7398_v50 = vand.u32 4294901760, %v6687_v53  ;;  %v7584_v42 = vld [vmem:[#allocation21_spill] sm:$0xff]  ;;  %v7408_v26 = vand.u32 4294901760, %v6703_v38  ;;  %v7407_v30 = vand.u32 4294901760, %v6707_v25 }
 0x140   :  { %v6699_v56 = vsel %vm1822_vm1, %v7584_v42, 0  ;;  %v7405_v42 = vand.u32 4294901760, %v6691_v14 }
 0x141   :  { %7580 = vst [vmem:[#allocation33_spill] sm:$0xff] %v6679_v61  ;;  %4927 = vmatpush3.bf16.xpose.msra.mxu0 %v6679_v61  ;;  %5119 = vmatpush3.bf16.xpose.msra.mxu1 %v6679_v61  ;;  %v6715_v43 = vpack.c.bf16 %v7398_v50, %v7399_v36  ;;  %v7404_v46 = vand.u32 4294901760, %v6699_v56  ;;  %v6733_v50 = vpack.c.bf16 %v7407_v30, %v7408_v26  ;;  %v7590_v36 = vld [vmem:[#allocation27_spill] sm:$0xff] }
 0x142   :  { %v6737_v39 = vsel %vm1822_vm1, %v7590_v36, 0  ;;  %v6758_v26 = vsub.f32 %v6433_v2, %v1971_v52  ;;  %v7414_v2 = vand.u32 4294901760, %v6763_v10 }
 0x143   :  { %7587 = vst [vmem:[#allocation9_spill] sm:$0xff] %v6715_v43  ;;  %4929 = vmatprep.subr.bf16.mxu0 %v6715_v43  ;;  %5121 = vmatprep.subr.bf16.mxu1 %v6715_v43  ;;  %v6727_v63 = vpack.c.bf16 %v7404_v46, %v7405_v42  ;;  %7589 = vst [vmem:[#allocation13_spill] sm:$0xff] %v6733_v50  ;;  %v7411_v46 = vand.u32 4294901760, %v6737_v39  ;;  %v7410_v42 = vand.u32 4294901760, %v6741_v8 }
 0x144   :  { %v2153_v24 = vsub.f32 %v6763_v10, %v7414_v2  ;;  %v7593_v2 = vand.u32 4294901760, %v6480_v45 }
 0x145   :  { %7588 = vst [vmem:[#allocation10_spill] sm:$0xff] %v6727_v63  ;;  %v6753_v22 = vpack.c.bf16 %v7410_v42, %v7411_v46  ;;  %v6788_v46 = vsub.f32 %v6461_v0, %v1977_v9  ;;  %v7595_v0 = vand.u32 4294901760, %v6565_v51  ;;  %v7596_v9 = vand.u32 4294901760, %v6571_v58 }
 0x147   :  { %7592 = vst [vmem:[#allocation15_spill] sm:$0xff] %v6753_v22  ;;  %v6812_v62 = vsub.f32 %v6565_v51, %v7595_v0  ;;  %v7599_v51 = vand.u32 4294901760, %v6609_v18 }
 0x149   :  { %4931 = vmatpush3.bf16.xpose.msra.mxu0 %v6727_v63  ;;  %5123 = vmatpush3.bf16.xpose.msra.mxu1 %v6727_v63 }
 0x14a   :  { %4933 = vmatprep.subr.bf16.mxu0 %v6733_v50  ;;  %5125 = vmatprep.subr.bf16.mxu1 %v6733_v50 }
 0x150   :  { %v3864_v44 = vpop.f32.mrb[4].mxu0 }
 0x151   :  { %v3865_v35 = vpop.f32.mrb[5].mxu0  ;;  %4935 = vmatpush3.bf16.xpose.msra.mxu0 %v6753_v22  ;;  %5127 = vmatpush3.bf16.xpose.msra.mxu1 %v6753_v22 }
 0x152   :  { %v3866_v36 = vadd.f32 %v3865_v35, %v3864_v44  ;;  %v6768_v35 = vsub.f32 %v6447_v5, %v1923_v31  ;;  %v6773_v44 = vsub.f32 %v6453_v20, %v1926_v49  ;;  %v2154_v31 = vand.u32 4294901760, %v2153_v24 }
 0x154   :  { %v838_v30 = vadd.f32 %v3866_v36, %v670_v21  ;;  %v7413_v21 = vand.u32 4294901760, %v6758_v26 }
 0x156   :  { %v2146_v59 = vsub.f32 %v6758_v26, %v7413_v21 }
 0x157   :  { %v3899_v52 = vpop.f32.mrb[4].mxu1 }
 0x158   :  { %v3900_v36 = vpop.f32.mrb[5].mxu1  ;;  %v2147_v20 = vand.u32 4294901760, %v2146_v59 }
 0x159   :  { %v3901_v5 = vadd.f32 %v3900_v36, %v3899_v52  ;;  %v6800_v52 = vsub.f32 %v6480_v45, %v7593_v2  ;;  %v6817_v45 = vsub.f32 %v6571_v58, %v7596_v9  ;;  %v7600_v58 = vand.u32 4294901760, %v6615_v7 }
 0x15a   :  { %v4936_v42 = vpack.c.bf16 %v2154_v31, %v2147_v20  ;;  %v6832_v20 = vsub.f32 %v6609_v18, %v7599_v51 }
 0x15b   :  { %v942_v49 = vadd.f32 %v3901_v5, %v838_v30  ;;  %v7594_v30 = vand.u32 4294901760, %v6493_v60  ;;  %v6837_v31 = vsub.f32 %v6615_v7, %v7600_v58  ;;  %v7604_v7 = vand.u32 4294901760, %v6655_v57 }
 0x15c   :  { %4937 = vmatprep.subr.bf16.mxu0 %v4936_v42  ;;  %5129 = vmatprep.subr.bf16.mxu1 %v4936_v42  ;;  %v7598_v42 = vand.u32 4294901760, %v6585_v19  ;;  %v7439_v12 = vand.u32 4294901760, %v6817_v45 }
 0x15d   :  { %v6795_v21 = vmul.f32 0.03125, %v942_v49  ;;  %v6805_v36 = vsub.f32 %v6493_v60, %v7594_v30  ;;  %v6822_v60 = vsub.f32 %v6579_v1, %v7597_v48  ;;  %v7601_v1 = vand.u32 4294901760, %v6623_v4 }
 0x15e   :  { %v6827_v2 = vsub.f32 %v6585_v19, %v7598_v42  ;;  %v7602_v19 = vand.u32 4294901760, %v6629_v27  ;;  %v7603_v42 = vand.u32 4294901760, %v6651_v41 }
 0x15f   :  { %1813 = vst.msk [vmem:[#allocation4] sm:$0xf] %vm1812_vm2, %v6795_v21  ;;  %v6842_v49 = vsub.f32 %v6623_v4, %v7601_v1  ;;  %v7605_v4 = vand.u32 4294901760, %v6661_v32  ;;  %v7608_v1 = vand.u32 4294901760, %v6687_v53 }
 0x160   :  { %v6847_v30 = vsub.f32 %v6629_v27, %v7602_v19  ;;  %v7606_v27 = vand.u32 4294901760, %v6665_v47  ;;  %v7609_v19 = vand.u32 4294901760, %v6691_v14 }
 0x161   :  { %v6862_v51 = vsub.f32 %v6661_v32, %v7605_v4 }
 0x162   :  { %v6867_v58 = vsub.f32 %v6665_v47, %v7606_v27  ;;  %v6882_v32 = vsub.f32 %v6691_v14, %v7609_v19  ;;  %v7449_v23 = vand.u32 4294901760, %v6847_v30 }
 0x170   :  { %v3934_v59 = vpop.f32.mrb[6].mxu0 }
 0x171   :  { %v3935_v24 = vpop.f32.mrb[7].mxu0 }
 0x172   :  { %v3936_v5 = vadd.f32 %v3935_v24, %v3934_v59  ;;  %v6852_v59 = vsub.f32 %v6651_v41, %v7603_v42  ;;  %v6857_v24 = vsub.f32 %v6655_v57, %v7604_v7  ;;  %v6877_v57 = vsub.f32 %v6687_v53, %v7608_v1 }
 0x177   :  { %v3969_v0 = vpop.f32.mrb[6].mxu1 }
 0x178   :  { %v3970_v9 = vpop.f32.mrb[7].mxu1 }
 0x179   :  { %v3971_v48 = vadd.f32 %v3970_v9, %v3969_v0  ;;  %v7610_v0 = vand.u32 4294901760, %v6699_v56 }
 0x17b   :  { %v1286_v18 = vadd.f32 %v3971_v48, %v3936_v5  ;;  %v7607_v5 = vand.u32 4294901760, %v6683_v28  ;;  %v6887_v47 = vsub.f32 %v6699_v56, %v7610_v0  ;;  %v1809_v56 = vmul.f32 %v6795_v21, %v6795_v21 }
 0x17d   :  { %v6872_v41 = vsub.f32 %v6683_v28, %v7607_v5 }
 0x190   :  { %v4004_v9 = vpop.f32.mrb[8].mxu0 }
 0x191   :  { %v4005_v48 = vpop.f32.mrb[9].mxu0 }
 0x192   :  { %v4006_v42 = vadd.f32 %v4005_v48, %v4004_v9  ;;  %v7429_v48 = vand.u32 4294901760, %v6773_v44 }
 0x194   :  { %v1424_v28 = vadd.f32 %v4006_v42, %v1286_v18  ;;  %v1815_v18 = vld [vmem:[%s7304_s1] sm:$0xf]  ;;  %v7427_v42 = vand.u32 4294901760, %v6793_v40  ;;  %s5409_s1 = smov [#allocation4]  }
 0x197   :  { %v4039_v7 = vpop.f32.mrb[8].mxu1 }
 0x198   :  { %v4040_v4 = vpop.f32.mrb[9].mxu1 }
 0x199   :  { %v4041_v27 = vadd.f32 %v4040_v4, %v4039_v7  ;;  %v2041_v7 = vsub.f32 %v6773_v44, %v7429_v48  ;;  %v7613_v48 = vand.u32 4294901760, %v6539_v29 }
 0x19b   :  { %v1532_v5 = vadd.f32 %v4041_v27, %v1424_v28 }
 0x1b0   :  { %v4074_v53 = vpop.f32.mrb[10].mxu0 }
 0x1b1   :  { %v4075_v1 = vpop.f32.mrb[11].mxu0 }
 0x1b2   :  { %v4076_v22 = vadd.f32 %v4075_v1, %v4074_v53  ;;  %v2167_v1 = vsub.f32 %v6793_v40, %v7427_v42 }
 0x1b4   :  { %v1700_v50 = vadd.f32 %v4076_v22, %v1532_v5  ;;  %v7430_v22 = vand.u32 4294901760, %v6768_v35  ;;  %v2168_v42 = vand.u32 4294901760, %v2167_v1 }
 0x1b7   :  { %v4109_v63 = vpop.f32.mrb[10].mxu1 }
 0x1b8   :  { %v4110_v14 = vpop.f32.mrb[11].mxu1 }
 0x1b9   :  { %v4111_v19 = vadd.f32 %v4110_v14, %v4109_v63  ;;  %v7611_v14 = vand.u32 4294901760, %v6501_v54 }
 0x1bb   :  { %v1804_v43 = vadd.f32 %v4111_v19, %v1700_v50  ;;  %v6921_v19 = vsub.f32 %v6501_v54, %v7611_v14 }
 0x1bd   :  { %v1808_v61 = vmul.f32 0.03125, %v1804_v43  ;;  %v7428_v43 = vand.u32 4294901760, %v6788_v46 }
 0x1bf   :  { %v1810_v0 = vsub.f32 %v1808_v61, %v1809_v56  ;;  %v2034_v61 = vsub.f32 %v6768_v35, %v7430_v22  ;;  %v2160_v5 = vsub.f32 %v6788_v46, %v7428_v43  ;;  %v7612_v56 = vand.u32 4294901760, %v6507_v37 }
 0x1c0   :  { %v6958_v22 = vsub.f32 %v6539_v29, %v7613_v48 }
 0x1c1   :  { %v1811_v17 = vmax.f32 %v1810_v0, 0.0  ;;  %v2161_v14 = vand.u32 4294901760, %v2160_v5 }
 0x1c3   :  { %v1816_v9 = vadd.f32 1e-05, %v1811_v17  ;;  %1814 = vst.msk [vmem:[#allocation6] sm:$0xf] %vm1812_vm2, %v1811_v17  ;;  %v1819_v17 = vld [vmem:[%s7305_s2] sm:$0xf] }
 0x1c4   :  { %s3667_s2 = sshll.u32 %s5409_s1, 4  ;;  %s3668_s2 = int_to_ptr.vmem [resolvable:$true] %s3667_s2 }
 0x1c5   :  { %5315 = vrsqrt.f32 %v1816_v9  ;;  %v2035_v9 = vand.u32 4294901760, %v2034_v61  ;;  %s5339_s12 = scalar_lea.vmem %s3668_s2, 64  ;;  %p5344_p1 = scmp.lt.s32.totalorder %s3668_s2, %s3668_s2 }
 0x1c6   :  { %p5340_p0 = scmp.ne.s32.totalorder %s3668_s2, %s5339_s12  ;;  %p5345_p2 = scmp.lt.s32.totalorder %s5339_s12, %s5339_s12 }
 0x1c8   :  { %p5346_p3 = por %p5345_p2, %p5344_p1 }
 0x1ca   :  { %p5347_p4 = pnand %p5346_p3, %p5340_p0 }
 0x1cf   :  { %v5316_v63 = vpop.eup %5315 }
 0x1d0   :  { %v1818_v50 = vmul.f32 %v5316_v63, %v1815_v18  ;;  %v2042_v18 = vand.u32 4294901760, %v2041_v7 }
 0x1d2   :  { %v1824_v28 = vsel %vm1822_vm1, %v1818_v50, 0  ;;  %v1820_v4 = vmul.f32 %v1818_v50, %v6795_v21  ;;  %v6926_v21 = vsub.f32 %v6507_v37, %v7612_v56  ;;  %v7431_v50 = vand.u32 4294901760, %v6800_v52 }
 0x1d3   :  { %v6910_v27 = vand.u32 4294901760, %v1824_v28  ;;  %v7433_v37 = vand.u32 4294901760, %v6921_v19 }
 0x1d4   :  { %v1821_v53 = vsub.f32 %v1819_v17, %v1820_v4  ;;  %v7432_v17 = vand.u32 4294901760, %v6805_v36  ;;  %v2048_v56 = vsub.f32 %v6800_v52, %v7431_v50 }
 0x1d5   :  { %v6929_v0 = vsub.f32 %v1824_v28, %v6910_v27  ;;  %v7434_v28 = vand.u32 4294901760, %v6926_v21  ;;  %v2174_v50 = vsub.f32 %v6921_v19, %v7433_v37 }
 0x1d6   :  { %v2778_v63 = vsel %vm1822_vm1, %v1821_v53, 0  ;;  %v4938_v53 = vpack.c.bf16 %v2042_v18, %v2035_v9  ;;  %v2055_v5 = vsub.f32 %v6805_v36, %v7432_v17  ;;  %v4940_v18 = vpack.c.bf16 %v2168_v42, %v2161_v14 }
 0x1d7   :  { %v6935_v4 = vand.u32 4294901760, %v6929_v0  ;;  %v6937_v54 = vand.u32 4294901760, %v2778_v63  ;;  %v2049_v29 = vand.u32 4294901760, %v2048_v56  ;;  %v7437_v42 = vand.u32 4294901760, %v6958_v22 }
 0x1d8   :  { %v2056_v48 = vand.u32 4294901760, %v2055_v5 }
 0x1d9   :  { %v2022_v61 = vsub.f32 %v6929_v0, %v6935_v4  ;;  %v6944_v7 = vsub.f32 %v2778_v63, %v6937_v54  ;;  %v7614_v63 = vand.u32 4294901760, %v6545_v13 }
 0x1da   :  { %v4942_v56 = vpack.c.bf16 %v2056_v48, %v2049_v29  ;;  %v2082_v29 = vand.u32 4294901760, %v6827_v2 }
 0x1db   :  { %v2023_v1 = vand.u32 4294901760, %v2022_v61  ;;  %v6953_v43 = vand.u32 4294901760, %v6944_v7  ;;  %v6963_v9 = vsub.f32 %v6545_v13, %v7614_v63  ;;  %v2181_v61 = vsub.f32 %v6926_v21, %v7434_v28 }
 0x1dc   :  { %v2175_v63 = vand.u32 4294901760, %v2174_v50  ;;  %v7440_v28 = vand.u32 4294901760, %v6812_v62 }
 0x1dd   :  { %4144 = vmatprep.mubr.f32.mxu0 %v2023_v1  ;;  %v2880_v17 = vsub.f32 %v6944_v7, %v6953_v43  ;;  %v7438_v14 = vand.u32 4294901760, %v6963_v9  ;;  %v2182_v37 = vand.u32 4294901760, %v2181_v61  ;;  %v7443_v61 = vand.u32 4294901760, %v6822_v60 }
 0x1de   :  { %4145 = vmatmul.mubr.f32.vlgmr.msra.gmra.mrb[12].mxu0 %v2023_v1  ;;  %v2188_v1 = vsub.f32 %v6812_v62, %v7440_v28 }
 0x1df   :  { %4939 = vmatpush3.bf16.xpose.msra.mxu0 %v4938_v53  ;;  %4178 = vmatprep.mubr.f32.mxu0 %v6910_v27  ;;  %v2881_v13 = vand.u32 4294901760, %v2880_v17  ;;  %v2062_v17 = vsub.f32 %v6958_v22, %v7437_v42  ;;  %v2069_v5 = vsub.f32 %v6963_v9, %v7438_v14  ;;  %v4944_v50 = vpack.c.bf16 %v2182_v37, %v2175_v63 }
 0x1e0   :  { %4941 = vmatprep.subr.bf16.mxu0 %v4940_v18  ;;  %v2189_v42 = vand.u32 4294901760, %v2188_v1  ;;  %v7448_v37 = vand.u32 4294901760, %v6832_v20  ;;  %v2076_v63 = vsub.f32 %v6822_v60, %v7443_v61  ;;  %v7447_v61 = vand.u32 4294901760, %v6842_v49 }
 0x1e1   :  { %4348 = vmatprep.mubr.f32.mxu1 %v2881_v13  ;;  %v2070_v48 = vand.u32 4294901760, %v2069_v5 }
 0x1e2   :  { %4349 = vmatmul.mubr.f32.vlgmr.msra.gmra.mrb[12].mxu1 %v2881_v13  ;;  %v2063_v13 = vand.u32 4294901760, %v2062_v17  ;;  %v2202_v5 = vsub.f32 %v6832_v20, %v7448_v37 }
 0x1e3   :  { %5131 = vmatpush3.bf16.xpose.msra.mxu1 %v4938_v53  ;;  %4382 = vmatprep.mubr.f32.mxu1 %v6937_v54  ;;  %v2195_v53 = vsub.f32 %v6817_v45, %v7439_v12  ;;  %v2083_v12 = vsub.f32 %v6827_v2, %v2082_v29 }
 0x1e4   :  { %5133 = vmatprep.subr.bf16.mxu1 %v4940_v18  ;;  %v7446_v18 = vand.u32 4294901760, %v6837_v31  ;;  %v4946_v28 = vpack.c.bf16 %v2070_v48, %v2063_v13  ;;  %v2090_v48 = vsub.f32 %v6842_v49, %v7447_v61 }
 0x1e5   :  { %v2196_v14 = vand.u32 4294901760, %v2195_v53  ;;  %v2077_v53 = vand.u32 4294901760, %v2076_v63  ;;  %v2084_v16 = vand.u32 4294901760, %v2083_v12  ;;  %v2097_v12 = vsub.f32 %v6847_v30, %v7449_v23 }
 0x1e6   :  { %v2209_v1 = vsub.f32 %v6837_v31, %v7446_v18  ;;  %v7454_v23 = vand.u32 4294901760, %v6872_v41 }
 0x1e7   :  { %4943 = vmatpush3.bf16.xpose.msra.mxu0 %v4942_v56  ;;  %v4948_v17 = vpack.c.bf16 %v2196_v14, %v2189_v42  ;;  %v2203_v42 = vand.u32 4294901760, %v2202_v5  ;;  %v4950_v13 = vpack.c.bf16 %v2084_v16, %v2077_v53  ;;  %v7452_v16 = vand.u32 4294901760, %v6862_v51 }
 0x1e8   :  { %4945 = vmatprep.subr.bf16.mxu0 %v4944_v50  ;;  %v2210_v14 = vand.u32 4294901760, %v2209_v1  ;;  %v2091_v1 = vand.u32 4294901760, %v2090_v48  ;;  %v2098_v53 = vand.u32 4294901760, %v2097_v12  ;;  %v7615_v12 = vand.u32 4294901760, %v6703_v38 }
 0x1ea   :  { %v4952_v5 = vpack.c.bf16 %v2210_v14, %v2203_v42  ;;  %v4954_v42 = vpack.c.bf16 %v2098_v53, %v2091_v1  ;;  %v7455_v1 = vand.u32 4294901760, %v6887_v47 }
 0x1eb   :  { %5135 = vmatpush3.bf16.xpose.msra.mxu1 %v4942_v56  ;;  %v7450_v56 = vand.u32 4294901760, %v6852_v59 }
 0x1ec   :  { %5137 = vmatprep.subr.bf16.mxu1 %v4944_v50  ;;  %v7451_v50 = vand.u32 4294901760, %v6857_v24 }
 0x1ed   :  { %v2216_v63 = vsub.f32 %v6852_v59, %v7450_v56  ;;  %v7453_v56 = vand.u32 4294901760, %v6877_v57 }
 0x1ee   :  { %v2223_v18 = vsub.f32 %v6857_v24, %v7451_v50  ;;  %v2104_v50 = vsub.f32 %v6862_v51, %v7452_v16  ;;  %v7616_v16 = vand.u32 4294901760, %v6707_v25 }
 0x1ef   :  { %4947 = vmatpush3.bf16.xpose.msra.mxu0 %v4946_v28  ;;  %v2217_v61 = vand.u32 4294901760, %v2216_v63  ;;  %v2237_v48 = vsub.f32 %v6877_v57, %v7453_v56  ;;  %v7042_v63 = vsub.f32 %v6703_v38, %v7615_v12 }
 0x1f0   :  { %4949 = vmatprep.subr.bf16.mxu0 %v4948_v17  ;;  %v2224_v37 = vand.u32 4294901760, %v2223_v18  ;;  %v2230_v18 = vsub.f32 %v6872_v41, %v7454_v23 }
 0x1f1   :  { %v2238_v56 = vand.u32 4294901760, %v2237_v48  ;;  %v7458_v23 = vand.u32 4294901760, %v7042_v63 }
 0x1f2   :  { %v4956_v14 = vpack.c.bf16 %v2224_v37, %v2217_v61  ;;  %v2105_v61 = vand.u32 4294901760, %v2104_v50  ;;  %v2231_v53 = vand.u32 4294901760, %v2230_v18  ;;  %v2125_v50 = vsub.f32 %v6887_v47, %v7455_v1 }
 0x1f3   :  { %5139 = vmatpush3.bf16.xpose.msra.mxu1 %v4946_v28  ;;  %v2110_v28 = vand.u32 4294901760, %v6867_v58  ;;  %v7618_v18 = vand.u32 4294901760, %v6741_v8 }
 0x1f4   :  { %5141 = vmatprep.subr.bf16.mxu1 %v4948_v17 }
 0x1f5   :  { %v2111_v17 = vsub.f32 %v6867_v58, %v2110_v28  ;;  %v7067_v48 = vsub.f32 %v6741_v8, %v7618_v18 }
 0x1f7   :  { %4951 = vmatpush3.bf16.xpose.msra.mxu0 %v4950_v13  ;;  %v2112_v37 = vand.u32 4294901760, %v2111_v17 }
 0x1f8   :  { %4953 = vmatprep.subr.bf16.mxu0 %v4952_v5 }
 0x1f9   :  { %v4958_v12 = vpack.c.bf16 %v2112_v37, %v2105_v61  ;;  %v2244_v61 = vsub.f32 %v7042_v63, %v7458_v23 }
 0x1fb   :  { %5143 = vmatpush3.bf16.xpose.msra.mxu1 %v4950_v13  ;;  %v7047_v13 = vsub.f32 %v6707_v25, %v7616_v16  ;;  %v7617_v16 = vand.u32 4294901760, %v6737_v39  ;;  %v2245_v8 = vand.u32 4294901760, %v2244_v61  ;;  %v4980_v61 = vpack.c.bf16 %v6817_v45, %v6812_v62 }
 0x1fc   :  { %5145 = vmatprep.subr.bf16.mxu1 %v4952_v5  ;;  %v7456_v5 = vand.u32 4294901760, %v6882_v32 }
 0x1fd   :  { %v7457_v38 = vand.u32 4294901760, %v7047_v13  ;;  %v7062_v17 = vsub.f32 %v6737_v39, %v7617_v16  ;;  %v7459_v16 = vand.u32 4294901760, %v7067_v48 }
 0x1fe   :  { %v2118_v25 = vsub.f32 %v6882_v32, %v7456_v5  ;;  %v2126_v5 = vand.u32 4294901760, %v2125_v50 }
 0x1ff   :  { %4955 = vmatpush3.bf16.xpose.msra.mxu0 %v4954_v42  ;;  %v2251_v37 = vsub.f32 %v7047_v13, %v7457_v38  ;;  %v2131_v39 = vand.u32 4294901760, %v7062_v17 }
 0x200   :  { %4957 = vmatprep.subr.bf16.mxu0 %v4956_v14  ;;  %v2119_v1 = vand.u32 4294901760, %v2118_v25 }
 0x201   :  { %v2252_v18 = vand.u32 4294901760, %v2251_v37  ;;  %v4982_v37 = vpack.c.bf16 %v6827_v2, %v6822_v60  ;;  %v7648_v2 = vand.u32 4294901760, %v6857_v24 }
 0x203   :  { %5147 = vmatpush3.bf16.xpose.msra.mxu1 %v4954_v42  ;;  %v4960_v42 = vpack.c.bf16 %v2238_v56, %v2231_v53  ;;  %v4962_v56 = vpack.c.bf16 %v2126_v5, %v2119_v1  ;;  %v2139_v53 = vsub.f32 %v7067_v48, %v7459_v16  ;;  %v4964_v25 = vpack.c.bf16 %v2252_v18, %v2245_v8 }
 0x204   :  { %5149 = vmatprep.subr.bf16.mxu1 %v4956_v14  ;;  %v2132_v14 = vsub.f32 %v7062_v17, %v2131_v39  ;;  %v4968_v5 = vpack.c.bf16 %v6763_v10, %v6758_v26  ;;  %v4970_v1 = vpack.c.bf16 %v6773_v44, %v6768_v35  ;;  %v4984_v8 = vpack.c.bf16 %v6837_v31, %v6832_v20 }
 0x205   :  { %v2140_v38 = vand.u32 4294901760, %v2139_v53  ;;  %v4986_v18 = vpack.c.bf16 %v6847_v30, %v6842_v49  ;;  %v4992_v53 = vpack.c.bf16 %v6877_v57, %v6872_v41 }
 0x206   :  { %v2133_v50 = vand.u32 4294901760, %v2132_v14  ;;  %v4990_v14 = vpack.c.bf16 %v6867_v58, %v6862_v51  ;;  %v7655_v58 = vand.u32 4294901760, %v7047_v13 }
 0x207   :  { %4959 = vmatpush3.bf16.xpose.msra.mxu0 %v4958_v12 }
 0x208   :  { %4961 = vmatprep.subr.bf16.mxu0 %v4960_v42  ;;  %v4966_v23 = vpack.c.bf16 %v2140_v38, %v2133_v50  ;;  %v4976_v38 = vpack.c.bf16 %v6926_v21, %v6921_v19  ;;  %v4996_v50 = vpack.c.bf16 %v7047_v13, %v7042_v63 }
 0x20b   :  { %5151 = vmatpush3.bf16.xpose.msra.mxu1 %v4958_v12  ;;  %v4972_v12 = vpack.c.bf16 %v6793_v40, %v6788_v46 }
 0x20c   :  { %5153 = vmatprep.subr.bf16.mxu1 %v4960_v42  ;;  %v4978_v42 = vpack.c.bf16 %v6963_v9, %v6958_v22 }
 0x20f   :  { %4963 = vmatpush3.bf16.xpose.msra.mxu0 %v4962_v56 }
 0x210   :  { %4965 = vmatprep.subr.bf16.mxu0 %v4964_v25 }
 0x213   :  { %5155 = vmatpush3.bf16.xpose.msra.mxu1 %v4962_v56  ;;  %v4988_v56 = vpack.c.bf16 %v6857_v24, %v6852_v59  ;;  %v7653_v24 = vand.u32 4294901760, %v6887_v47 }
 0x214   :  { %5157 = vmatprep.subr.bf16.mxu1 %v4964_v25  ;;  %v4994_v25 = vpack.c.bf16 %v6887_v47, %v6882_v32 }
 0x217   :  { %4967 = vmatpush3.bf16.xpose.msra.mxu0 %v4966_v23 }
 0x218   :  { %4969 = vmatprep.subr.bf16.mxu0 %v4968_v5 }
 0x21b   :  { %5159 = vmatpush3.bf16.xpose.msra.mxu1 %v4966_v23  ;;  %v4974_v23 = vpack.c.bf16 %v6805_v36, %v6800_v52 }
 0x21c   :  { %5161 = vmatprep.subr.bf16.mxu1 %v4968_v5  ;;  %v4998_v5 = vpack.c.bf16 %v7067_v48, %v7062_v17 }
 0x21e   :  { %4179 = vmatmul.mubr.f32.vlgmr.msra.gmra.mrb[12].mxu0 %v6910_v27 }
 0x21f   :  { %4971 = vmatpush3.bf16.xpose.msra.mxu0 %v4970_v1  ;;  %4212 = vmatprep.mubr.f32.mxu0 %v6929_v0 }
 0x220   :  { %4973 = vmatprep.subr.bf16.mxu0 %v4972_v12 }
 0x222   :  { %4383 = vmatmul.mubr.f32.vlgmr.msra.gmra.mrb[12].mxu1 %v6937_v54 }
 0x223   :  { %5163 = vmatpush3.bf16.xpose.msra.mxu1 %v4970_v1  ;;  %4416 = vmatprep.mubr.f32.mxu1 %v6944_v7  ;;  %v7621_v1 = vld [vmem:[#allocation30_spill] sm:$0xff] }
 0x224   :  { %5165 = vmatprep.subr.bf16.mxu1 %v4972_v12  ;;  %v7622_v12 = vld [vmem:[#allocation37_spill] sm:$0xff] }
 0x227   :  { %4975 = vmatpush3.bf16.xpose.msra.mxu0 %v4974_v23 }
 0x228   :  { %4977 = vmatprep.subr.bf16.mxu0 %v4976_v38 }
 0x22b   :  { %5167 = vmatpush3.bf16.xpose.msra.mxu1 %v4974_v23  ;;  %v7623_v23 = vld [vmem:[#allocation33_spill] sm:$0xff] }
 0x22c   :  { %5169 = vmatprep.subr.bf16.mxu1 %v4976_v38  ;;  %v7624_v38 = vld [vmem:[#allocation9_spill] sm:$0xff] }
 0x22f   :  { %4979 = vmatpush3.bf16.xpose.msra.mxu0 %v4978_v42 }
 0x230   :  { %4981 = vmatprep.subr.bf16.mxu0 %v4980_v61 }
 0x233   :  { %5171 = vmatpush3.bf16.xpose.msra.mxu1 %v4978_v42  ;;  %v7625_v42 = vld [vmem:[#allocation10_spill] sm:$0xff] }
 0x234   :  { %5173 = vmatprep.subr.bf16.mxu1 %v4980_v61  ;;  %v7626_v61 = vld [vmem:[#allocation13_spill] sm:$0xff] }
 0x237   :  { %4983 = vmatpush3.bf16.xpose.msra.mxu0 %v4982_v37 }
 0x238   :  { %4985 = vmatprep.subr.bf16.mxu0 %v4984_v8 }
 0x23b   :  { %5175 = vmatpush3.bf16.xpose.msra.mxu1 %v4982_v37  ;;  %v7627_v37 = vand.u32 4294901760, %v6758_v26  ;;  %v7635_v26 = vand.u32 4294901760, %v6805_v36  ;;  %v7641_v36 = vand.u32 4294901760, %v6817_v45  ;;  %v7646_v45 = vand.u32 4294901760, %v6847_v30 }
 0x23c   :  { %5177 = vmatprep.subr.bf16.mxu1 %v4984_v8  ;;  %v7628_v8 = vand.u32 4294901760, %v6763_v10  ;;  %v7634_v10 = vand.u32 4294901760, %v6800_v52  ;;  %v7640_v52 = vand.u32 4294901760, %v6812_v62  ;;  %v7645_v62 = vand.u32 4294901760, %v6842_v49 }
 0x23d   :  { %v7650_v49 = vand.u32 4294901760, %v6872_v41  ;;  %v7651_v30 = vand.u32 4294901760, %v6877_v57  ;;  %v7656_v41 = vand.u32 4294901760, %v7067_v48 }
 0x23f   :  { %4987 = vmatpush3.bf16.xpose.msra.mxu0 %v4986_v18  ;;  %v5062_v57 = vpack.c.bf16 %v7656_v41, %v2131_v39 }
 0x240   :  { %4989 = vmatprep.subr.bf16.mxu0 %v4988_v56 }
 0x243   :  { %5179 = vmatpush3.bf16.xpose.msra.mxu1 %v4986_v18  ;;  %v5032_v18 = vpack.c.bf16 %v7628_v8, %v7627_v37  ;;  %v5044_v8 = vpack.c.bf16 %v7641_v36, %v7640_v52 }
 0x244   :  { %5181 = vmatprep.subr.bf16.mxu1 %v4988_v56  ;;  %v7629_v56 = vld [vmem:[#allocation15_spill] sm:$0xff] }
 0x247   :  { %4991 = vmatpush3.bf16.xpose.msra.mxu0 %v4990_v14 }
 0x248   :  { %4993 = vmatprep.subr.bf16.mxu0 %v4992_v53 }
 0x24b   :  { %5183 = vmatpush3.bf16.xpose.msra.mxu1 %v4990_v14  ;;  %v7630_v14 = vand.u32 4294901760, %v6768_v35  ;;  %v5038_v35 = vpack.c.bf16 %v7635_v26, %v7634_v10 }
 0x24c   :  { %5185 = vmatprep.subr.bf16.mxu1 %v4992_v53  ;;  %v7631_v53 = vand.u32 4294901760, %v6773_v44 }
 0x24f   :  { %4995 = vmatpush3.bf16.xpose.msra.mxu0 %v4994_v25 }
 0x250   :  { %4997 = vmatprep.subr.bf16.mxu0 %v4996_v50 }
 0x253   :  { %5187 = vmatpush3.bf16.xpose.msra.mxu1 %v4994_v25  ;;  %v5034_v25 = vpack.c.bf16 %v7631_v53, %v7630_v14  ;;  %v5056_v14 = vpack.c.bf16 %v7651_v30, %v7650_v49 }
 0x254   :  { %5189 = vmatprep.subr.bf16.mxu1 %v4996_v50  ;;  %v7632_v50 = vand.u32 4294901760, %v6788_v46  ;;  %v7637_v46 = vand.u32 4294901760, %v6926_v21 }
 0x257   :  { %4999 = vmatpush3.bf16.xpose.msra.mxu0 %v4998_v5 }
 0x258   :  { %5001 = vmatprep.subr.bf16.mxu0 %v6467_v55 }
 0x25b   :  { %5191 = vmatpush3.bf16.xpose.msra.mxu1 %v4998_v5  ;;  %v7633_v5 = vand.u32 4294901760, %v6793_v40  ;;  %v7636_v40 = vand.u32 4294901760, %v6921_v19  ;;  %v7642_v19 = vand.u32 4294901760, %v6822_v60  ;;  %v7647_v60 = vand.u32 4294901760, %v6852_v59 }
 0x25c   :  { %5193 = vmatprep.subr.bf16.mxu1 %v6467_v55  ;;  %v7652_v59 = vand.u32 4294901760, %v6882_v32 }
 0x25d   :  { %v5036_v16 = vpack.c.bf16 %v7633_v5, %v7632_v50  ;;  %v5040_v44 = vpack.c.bf16 %v7637_v46, %v7636_v40  ;;  %v5046_v21 = vpack.c.bf16 %v2082_v29, %v7642_v19  ;;  %v5052_v29 = vpack.c.bf16 %v7648_v2, %v7647_v60 }
 0x25e   :  { %4213 = vmatmul.mubr.f32.vlgmr.msra.gmra.mrb[12].mxu0 %v6929_v0  ;;  %v7619_v0 = vld [vmem:[#allocation31_spill] sm:$0xff]  ;;  %v5058_v53 = vpack.c.bf16 %v7653_v24, %v7652_v59 }
 0x25f   :  { %5003 = vmatpush3.bf16.xpose.msra.mxu0 %v6486_v34  ;;  %4246 = vmatprep.mubr.f32.mxu0 %v6935_v4 }
 0x260   :  { %5005 = vmatprep.subr.bf16.mxu0 %v6515_v11 }
 0x262   :  { %4417 = vmatmul.mubr.f32.vlgmr.msra.gmra.mrb[12].mxu1 %v6944_v7  ;;  %v7620_v7 = vld [vmem:[#allocation26_spill] sm:$0xff] }
 0x263   :  { %5195 = vmatpush3.bf16.xpose.msra.mxu1 %v6486_v34  ;;  %4450 = vmatprep.mubr.f32.mxu1 %v6953_v43 }
 0x264   :  { %5197 = vmatprep.subr.bf16.mxu1 %v6515_v11 }
 0x267   :  { %5007 = vmatpush3.bf16.xpose.msra.mxu0 %v6527_v3 }
 0x268   :  { %5009 = vmatprep.subr.bf16.mxu0 %v6533_v33 }
 0x26b   :  { %5199 = vmatpush3.bf16.xpose.msra.mxu1 %v6527_v3 }
 0x26c   :  { %5201 = vmatprep.subr.bf16.mxu1 %v6533_v33 }
 0x26f   :  { %5011 = vmatpush3.bf16.xpose.msra.mxu0 %v6557_v6 }
 0x270   :  { %5013 = vmatprep.subr.bf16.mxu0 %v6592_v15 }
 0x273   :  { %5203 = vmatpush3.bf16.xpose.msra.mxu1 %v6557_v6 }
 0x274   :  { %5205 = vmatprep.subr.bf16.mxu1 %v6592_v15 }
 0x277   :  { %5015 = vmatpush3.bf16.xpose.msra.mxu0 %v7619_v0 }
 0x278   :  { %5017 = vmatprep.subr.bf16.mxu0 %v7620_v7 }
 0x27b   :  { %5207 = vmatpush3.bf16.xpose.msra.mxu1 %v7619_v0 }
 0x27c   :  { %5209 = vmatprep.subr.bf16.mxu1 %v7620_v7 }
 0x27f   :  { %5019 = vmatpush3.bf16.xpose.msra.mxu0 %v7621_v1 }
 0x280   :  { %5021 = vmatprep.subr.bf16.mxu0 %v7622_v12 }
 0x283   :  { %5211 = vmatpush3.bf16.xpose.msra.mxu1 %v7621_v1 }
 0x284   :  { %5213 = vmatprep.subr.bf16.mxu1 %v7622_v12 }
 0x287   :  { %5023 = vmatpush3.bf16.xpose.msra.mxu0 %v7623_v23 }
 0x288   :  { %5025 = vmatprep.subr.bf16.mxu0 %v7624_v38 }
 0x28b   :  { %5215 = vmatpush3.bf16.xpose.msra.mxu1 %v7623_v23 }
 0x28c   :  { %5217 = vmatprep.subr.bf16.mxu1 %v7624_v38 }
 0x28f   :  { %5027 = vmatpush3.bf16.xpose.msra.mxu0 %v7625_v42 }
 0x290   :  { %5029 = vmatprep.subr.bf16.mxu0 %v7626_v61 }
 0x293   :  { %5219 = vmatpush3.bf16.xpose.msra.mxu1 %v7625_v42 }
 0x294   :  { %5221 = vmatprep.subr.bf16.mxu1 %v7626_v61 }
 0x297   :  { %5031 = vmatpush3.bf16.xpose.msra.mxu0 %v7629_v56 }
 0x298   :  { %5033 = vmatprep.subr.bf16.mxu0 %v5032_v18 }
 0x29b   :  { %5223 = vmatpush3.bf16.xpose.msra.mxu1 %v7629_v56 }
 0x29c   :  { %5225 = vmatprep.subr.bf16.mxu1 %v5032_v18  ;;  %v5050_v18 = vpack.c.bf16 %v7646_v45, %v7645_v62 }
 0x29e   :  { %4247 = vmatmul.mubr.f32.vlgmr.msra.gmra.mrb[12].mxu0 %v6935_v4  ;;  %v7638_v4 = vand.u32 4294901760, %v6958_v22  ;;  %v7643_v22 = vand.u32 4294901760, %v6832_v20  ;;  %v7649_v20 = vand.u32 4294901760, %v6862_v51  ;;  %v7654_v51 = vand.u32 4294901760, %v7042_v63 }
 0x29f   :  { %5035 = vmatpush3.bf16.xpose.msra.mxu0 %v5034_v25  ;;  %4280 = vmatprep.mubr.f32.mxu0 %v6910_v27 }
 0x2a0   :  { %5037 = vmatprep.subr.bf16.mxu0 %v5036_v16 }
 0x2a2   :  { %4451 = vmatmul.mubr.f32.vlgmr.msra.gmra.mrb[12].mxu1 %v6953_v43  ;;  %v7639_v43 = vand.u32 4294901760, %v6963_v9  ;;  %v7644_v9 = vand.u32 4294901760, %v6837_v31  ;;  %v5054_v31 = vpack.c.bf16 %v2110_v28, %v7649_v20  ;;  %v5060_v28 = vpack.c.bf16 %v7655_v58, %v7654_v51 }
 0x2a3   :  { %5227 = vmatpush3.bf16.xpose.msra.mxu1 %v5034_v25  ;;  %4484 = vmatprep.mubr.f32.mxu1 %v6937_v54 }
 0x2a4   :  { %5229 = vmatprep.subr.bf16.mxu1 %v5036_v16  ;;  %v5042_v37 = vpack.c.bf16 %v7639_v43, %v7638_v4  ;;  %v5048_v16 = vpack.c.bf16 %v7644_v9, %v7643_v22 }
 0x2a7   :  { %5039 = vmatpush3.bf16.xpose.msra.mxu0 %v5038_v35 }
 0x2a8   :  { %5041 = vmatprep.subr.bf16.mxu0 %v5040_v44 }
 0x2ab   :  { %5231 = vmatpush3.bf16.xpose.msra.mxu1 %v5038_v35 }
 0x2ac   :  { %5233 = vmatprep.subr.bf16.mxu1 %v5040_v44 }
 0x2af   :  { %5043 = vmatpush3.bf16.xpose.msra.mxu0 %v5042_v37 }
 0x2b0   :  { %5045 = vmatprep.subr.bf16.mxu0 %v5044_v8 }
 0x2b3   :  { %5235 = vmatpush3.bf16.xpose.msra.mxu1 %v5042_v37 }
 0x2b4   :  { %5237 = vmatprep.subr.bf16.mxu1 %v5044_v8 }
 0x2b7   :  { %5047 = vmatpush3.bf16.xpose.msra.mxu0 %v5046_v21 }
 0x2b8   :  { %5049 = vmatprep.subr.bf16.mxu0 %v5048_v16 }
 0x2bb   :  { %5239 = vmatpush3.bf16.xpose.msra.mxu1 %v5046_v21 }
 0x2bc   :  { %5241 = vmatprep.subr.bf16.mxu1 %v5048_v16 }
 0x2bf   :  { %5051 = vmatpush3.bf16.xpose.msra.mxu0 %v5050_v18 }
 0x2c0   :  { %5053 = vmatprep.subr.bf16.mxu0 %v5052_v29 }
 0x2c3   :  { %5243 = vmatpush3.bf16.xpose.msra.mxu1 %v5050_v18 }
 0x2c4   :  { %5245 = vmatprep.subr.bf16.mxu1 %v5052_v29 }
 0x2c7   :  { %5055 = vmatpush3.bf16.xpose.msra.mxu0 %v5054_v31 }
 0x2c8   :  { %5057 = vmatprep.subr.bf16.mxu0 %v5056_v14 }
 0x2cb   :  { %5247 = vmatpush3.bf16.xpose.msra.mxu1 %v5054_v31 }
 0x2cc   :  { %5249 = vmatprep.subr.bf16.mxu1 %v5056_v14 }
 0x2cf   :  { %5059 = vmatpush3.bf16.xpose.msra.mxu0 %v5058_v53 }
 0x2d0   :  { %5061 = vmatprep.subr.bf16.mxu0 %v5060_v28 }
 0x2d3   :  { %5251 = vmatpush3.bf16.xpose.msra.mxu1 %v5058_v53 }
 0x2d4   :  { %5253 = vmatprep.subr.bf16.mxu1 %v5060_v28 }
 0x2d7   :  { %5063 = vmatpush3.bf16.xpose.msra.mxu0 %v5062_v57 }
 0x2d8   :  { %5065 = vmatprep.subr.bf16.mxu0 %v6467_v55 }
 0x2db   :  { %5255 = vmatpush3.bf16.xpose.msra.mxu1 %v5062_v57 }
 0x2dc   :  { %5257 = vmatprep.subr.bf16.mxu1 %v6467_v55 }
 0x2de   :  { %4281 = vmatmul.mubr.f32.vlgmr.msra.gmra.mrb[12].mxu0 %v6910_v27 }
 0x2df   :  { %5067 = vmatpush3.bf16.xpose.msra.mxu0 %v6486_v34  ;;  %4314 = vmatprep.mubr.f32.mxu0 %v6910_v27 }
 0x2e0   :  { %5069 = vmatprep.subr.bf16.mxu0 %v6515_v11 }
 0x2e2   :  { %4485 = vmatmul.mubr.f32.vlgmr.msra.gmra.mrb[12].mxu1 %v6937_v54 }
 0x2e3   :  { %5259 = vmatpush3.bf16.xpose.msra.mxu1 %v6486_v34  ;;  %4518 = vmatprep.mubr.f32.mxu1 %v6937_v54 }
 0x2e4   :  { %5261 = vmatprep.subr.bf16.mxu1 %v6515_v11 }
 0x2e7   :  { %5071 = vmatpush3.bf16.xpose.msra.mxu0 %v6527_v3 }
 0x2e8   :  { %5073 = vmatprep.subr.bf16.mxu0 %v6533_v33 }
 0x2eb   :  { %5263 = vmatpush3.bf16.xpose.msra.mxu1 %v6527_v3 }
 0x2ec   :  { %5265 = vmatprep.subr.bf16.mxu1 %v6533_v33 }
 0x2ef   :  { %5075 = vmatpush3.bf16.xpose.msra.mxu0 %v6557_v6 }
 0x2f0   :  { %5077 = vmatprep.subr.bf16.mxu0 %v6592_v15 }
 0x2f3   :  { %5267 = vmatpush3.bf16.xpose.msra.mxu1 %v6557_v6 }
 0x2f4   :  { %5269 = vmatprep.subr.bf16.mxu1 %v6592_v15 }
 0x2f7   :  { %5079 = vmatpush3.bf16.xpose.msra.mxu0 %v7619_v0 }
 0x2f8   :  { %5081 = vmatprep.subr.bf16.mxu0 %v7620_v7 }
 0x2fb   :  { %5271 = vmatpush3.bf16.xpose.msra.mxu1 %v7619_v0 }
 0x2fc   :  { %5273 = vmatprep.subr.bf16.mxu1 %v7620_v7 }
 0x2ff   :  { %5083 = vmatpush3.bf16.xpose.msra.mxu0 %v7621_v1 }
 0x300   :  { %5085 = vmatprep.subr.bf16.mxu0 %v7622_v12 }
 0x303   :  { %5275 = vmatpush3.bf16.xpose.msra.mxu1 %v7621_v1 }
 0x304   :  { %5277 = vmatprep.subr.bf16.mxu1 %v7622_v12 }
 0x307   :  { %5087 = vmatpush3.bf16.xpose.msra.mxu0 %v7623_v23 }
 0x308   :  { %5089 = vmatprep.subr.bf16.mxu0 %v7624_v38 }
 0x30b   :  { %5279 = vmatpush3.bf16.xpose.msra.mxu1 %v7623_v23 }
 0x30c   :  { %5281 = vmatprep.subr.bf16.mxu1 %v7624_v38 }
 0x30f   :  { %5091 = vmatpush3.bf16.xpose.msra.mxu0 %v7625_v42 }
 0x310   :  { %5093 = vmatprep.subr.bf16.mxu0 %v7626_v61 }
 0x313   :  { %5283 = vmatpush3.bf16.xpose.msra.mxu1 %v7625_v42 }
 0x314   :  { %5285 = vmatprep.subr.bf16.mxu1 %v7626_v61 }
 0x317   :  { %5095 = vmatpush3.bf16.xpose.msra.mxu0 %v7629_v56 }
 0x31b   :  { %5287 = vmatpush3.bf16.xpose.msra.mxu1 %v7629_v56 }
 0x31e   :  { %4315 = vmatmul.mubr.f32.vlgmr.msra.gmra.mrb[12].mxu0 %v6910_v27 }
 0x322   :  { %4519 = vmatmul.mubr.f32.vlgmr.msra.gmra.mrb[12].mxu1 %v6937_v54 }
 0x323   :  { %5350 = shalt.err (!%p5347_p4)
}
 0x324   :  { %s5351_s15 = scalar_lea.hbm %s7308_s5, 64 }
 0x325   :  { %p5352_p5 = scmp.ne.s32.totalorder %s7308_s5, %s5351_s15  ;;  %p5355_p6 = scmp.lt.u32.totalorder %s5351_s15, %s7308_s5 }
 0x327   :  { %p5357_p7 = pnand %p5355_p6, %p5352_p5 }
 0x329   :  { %5360 = shalt.err (!%p5357_p7)
}
 0x32a   :  { %3670 = dma.vmem_to_hbm [thread:$0]  %s3668_s2, 64, %s7308_s5, [#allocation5]  }
 0x32b   :  { %s5410_s22 = smov [#allocation6]  }
 0x32c   :  { %s3677_s23 = sshll.u32 %s5410_s22, 4  ;;  %s3678_s23 = int_to_ptr.vmem [resolvable:$true] %s3677_s23 }
 0x32d   :  { %s5361_s24 = scalar_lea.vmem %s3678_s23, 64  ;;  %p5366_p9 = scmp.lt.s32.totalorder %s3678_s23, %s3678_s23 }
 0x32e   :  { %p5362_p8 = scmp.ne.s32.totalorder %s3678_s23, %s5361_s24  ;;  %p5367_p10 = scmp.lt.s32.totalorder %s5361_s24, %s5361_s24 }
 0x330   :  { %p5368_p11 = por %p5367_p10, %p5366_p9 }
 0x332   :  { %p5369_p12 = pnand %p5368_p11, %p5362_p8 }
 0x334   :  { %5372 = shalt.err (!%p5369_p12)
}
 0x335   :  { %s5373_s27 = scalar_lea.hbm %s7309_s6, 64 }
 0x336   :  { %p5374_p13 = scmp.ne.s32.totalorder %s7309_s6, %s5373_s27  ;;  %p5377_p0 = scmp.lt.u32.totalorder %s5373_s27, %s7309_s6 }
 0x338   :  { %p5379_p1 = pnand %p5377_p0, %p5374_p13 }
 0x33a   :  { %5382 = shalt.err (!%p5379_p1)
}
 0x33b   :  { %3680 = dma.vmem_to_hbm [thread:$0]  %s3678_s23, 64, %s7309_s6, [#allocation5]   ;;  %v5337_v6 = vld [vmem:[%s7303_s0] sm:$0xff]  ;;  %v5338_v32 = vld [vmem:[%s7303_s0 + $0x8] sm:$0xff] }
 0x33c   :  { %s5411_s3 = smov [#allocation2]  }
 0x33d   :  { %s3654_s9 = sshll.u32 %s5411_s3, 4  ;;  %s3655_s9 = int_to_ptr.vmem [resolvable:$true] %s3654_s9 }
 0x33e   :  { %s5383_s6 = scalar_lea.vmem %s3655_s9, 256  ;;  %p5388_p3 = scmp.lt.s32.totalorder %s3655_s9, %s3655_s9 }
 0x33f   :  { %p5384_p2 = scmp.ne.s32.totalorder %s3655_s9, %s5383_s6  ;;  %p5389_p4 = scmp.lt.s32.totalorder %s5383_s6, %s5383_s6 }
 0x341   :  { %p5390_p5 = por %p5389_p4, %p5388_p3 }
 0x343   :  { %p5391_p6 = pnand %p5390_p5, %p5384_p2 }
 0x3f1   :  { %v2772_v55 = vpop.f32.mrb[12].mxu0 }
 0x3f2   :  { %v2774_v34 = vpop.f32.mrb[13].mxu0 }
 0x3f3   :  { %v3637_v11 = vcombine.low %v2772_v55, %v2774_v34 }
 0x3f5   :  { %v3630_v3 = vpop.f32.mrb[12].mxu1  ;;  %v3639_v15 = vmul.f32 %v5337_v6, %v3637_v11  ;;  %v3640_v47 = vmul.f32 %v5338_v32, %v3637_v11 }
 0x3f6   :  { %v3632_v33 = vpop.f32.mrb[13].mxu1 }
 0x3f7   :  { %v3643_v27 = vcombine.low %v3630_v3, %v3632_v33 }
 0x3f9   :  { %v3645_v54 = vadd.f32 %v3643_v27, %v3639_v15  ;;  %v3646_v63 = vadd.f32 %v3643_v27, %v3640_v47 }
 0x3fb   :  { %3647 = vst [vmem:[#allocation2] sm:$0xff] %v3645_v54  ;;  %3648 = vst [vmem:[#allocation2 + $0x8] sm:$0xff] %v3646_v63 }
 0x3fc   :  { %5394 = shalt.err (!%p5391_p6)
}
 0x3fd   :  { %s5395_s14 = scalar_lea.hbm %s7307_s4, 256 }
 0x3fe   :  { %p5396_p7 = scmp.ne.s32.totalorder %s7307_s4, %s5395_s14  ;;  %p5399_p8 = scmp.lt.u32.totalorder %s5395_s14, %s7307_s4 }
 0x400   :  { %p5401_p9 = pnand %p5399_p8, %p5396_p7 }
 0x402   :  { %5404 = shalt.err (!%p5401_p9)
}
 0x403   :  { %s5412_s18 = smov 128   ;;  %s5413_s19 = smov 8  }
 0x404   :  { %3660 = dma.vmem_to_hbm [thread:$0]  %s3655_s9, 256, %s7307_s4, [#allocation3], %s5412_s18, %s5412_s18, %s5413_s19  }
 0x405   :  { %5405 = dma.done.wait [#allocation3], 256  }
 0x406   :  { %5406 = vsyncadd [#allocation3], 4294967040 }
 0x407   :  { %5407 = dma.done.wait [#allocation5], 128  }
 0x408   :  { %5408 = vsyncadd [#allocation5], 4294967168 }
 0x409   :  { %3690 = vsyncpa [#allocation3], 1 }
 0x40a   :  { %3691 = vsyncpa [#allocation5], 1 }

</bundles_post_ra>
